<compile_context>
chip_gen: v7x
topology: tpu7x:2x2x1
jax: 0.10.0
libtpu: 0.0.40
codegen_flags: <defaults>
</compile_context>

<pallas_src>
import functools

import numpy as np
import jax
import jax.numpy as jnp
from jax.experimental import pallas as pl
from jax.experimental.pallas import tpu as pltpu


# ----------------------------------------------------------------------------
# Pallas kernel: full encoder stack; grid = (batch_block, layer)
# ----------------------------------------------------------------------------
def _encoder_stack_kernel(x_ref, pos_ref, kb_ref,
                          wqk_ref, wv_ref, wo_ref, w1_ref, w2_ref,
                          bqk_ref, b1_ref, dvec_ref,
                          o_ref, *, nhead):
    layer = pl.program_id(1)

    # Layer 0 seeds the resident activation; o_ref's block index is constant along the
    # layer axis so it stays in VMEM and acts as the layer-to-layer carry.
    @pl.when(layer == 0)
    def _():
        o_ref[...] = x_ref[...]

    x3 = o_ref[...]                          # (bb, L, D) f32 current layer input
    bb, L, D = x3.shape
    hd = D // nhead

    kb = kb_ref[...]                         # (bb, 1, L) f32 additive key-padding bias

    wqk = wqk_ref[0]                         # (D, 2D) bf16, Q half pre-scaled by 1/sqrt(hd)
    wv = wv_ref[0]                           # (D, D)  bf16
    wo = wo_ref[0]                           # (D, D)  bf16, rows head-major (h*hd + d)
    w1 = w1_ref[0]                           # (D, F)  bf16
    w2 = w2_ref[0]                           # (F, D)  bf16
    bqk = bqk_ref[0]                         # (1, 2D) f32 (Q half pre-scaled)
    b1 = b1_ref[0]                           # (1, F)  f32
    dvec = dvec_ref[0]                       # (7, D)  f32: bv, bo, b2, g1, be1, g2, be2
    bv, bo, b2 = dvec[0:1], dvec[1:2], dvec[2:3]
    g1, be1, g2, be2 = dvec[3:4], dvec[4:5], dvec[5:6], dvec[6:7]

    bf = jnp.bfloat16
    f32 = jnp.float32

    xf = x3.reshape(bb * L, D)                       # (bbL, D) f32
    qkf = (x3 + pos_ref[...]).reshape(bb * L, D)     # q/k get the pos embed, v uses raw x

    # --- lane-dense input projections (full-width MXU, bf16 operands, f32 accum) -------
    QK = jnp.dot(qkf.astype(bf), wqk, preferred_element_type=f32) + bqk   # (bbL, 2D)
    Vp = jnp.dot(xf.astype(bf), wv, preferred_element_type=f32) + bv      # (bbL, D)

    Q3 = QK[:, :D].reshape(bb, L, D)
    K3 = QK[:, D:].reshape(bb, L, D)
    V3 = Vp.reshape(bb, L, D)

    # --- attention core: static per-head loop of bb-batched rank-3 dot_generals --------
    attn = jnp.zeros((bb * L, D), dtype=f32)
    for h in range(nhead):
        sl = slice(h * hd, (h + 1) * hd)
        Qh = Q3[:, :, sl].astype(bf)                                      # (bb, L, hd)
        Kh = K3[:, :, sl].astype(bf)
        Vh = V3[:, :, sl].astype(bf)
        s = jax.lax.dot_general(Qh, Kh, (((2,), (2,)), ((0,), (0,))),
                                preferred_element_type=f32) + kb          # (bb, L, L)
        s = s - jnp.max(s, axis=-1, keepdims=True)
        p = jnp.exp(s)
        # EUP reciprocal of the row sum instead of an (L, L)-wide VALU divide.
        p = p * pl.reciprocal(jnp.sum(p, axis=-1, keepdims=True), approx=True)
        ctx = jax.lax.dot_general(p.astype(bf), Vh, (((2,), (1,)), ((0,), (0,))),
                                  preferred_element_type=f32)             # (bb, L, hd)
        # Per-head output projection with full D-wide MXU output, f32 accumulation.
        attn = attn + jnp.dot(ctx.reshape(bb * L, hd).astype(bf), wo[sl, :],
                              preferred_element_type=f32)
    attn = attn + bo

    # --- residual + LayerNorm 1 (f32) ---------------------------------------------------
    y = xf + attn
    mu = jnp.mean(y, axis=-1, keepdims=True)
    var = jnp.mean((y - mu) ** 2, axis=-1, keepdims=True)
    y = (y - mu) * jax.lax.rsqrt(var + 1e-5) * g1 + be1

    # --- feed-forward (ReLU) + residual + LayerNorm 2 ------------------------------------
    h1 = jnp.dot(y.astype(bf), w1, preferred_element_type=f32) + b1
    h1 = jnp.maximum(h1, 0.0)
    f = jnp.dot(h1.astype(bf), w2, preferred_element_type=f32) + b2

    z = y + f
    mu2 = jnp.mean(z, axis=-1, keepdims=True)
    var2 = jnp.mean((z - mu2) ** 2, axis=-1, keepdims=True)
    z = (z - mu2) * jax.lax.rsqrt(var2 + 1e-5) * g2 + be2
    o_ref[...] = z.reshape(bb, L, D)


# ----------------------------------------------------------------------------
# VMEM budget from the real block sizes (double-buffered inputs + intermediates)
# ----------------------------------------------------------------------------
def _vmem_limit_bytes(bb, L, D, F):
    f4, b2 = 4, 2
    weights = (D * 2 * D + 3 * D * D + 2 * D * F) * b2 + (2 * D + F + 7 * D) * f4
    act_in = (2 * bb * L * D + bb * L) * f4           # src, pos, key bias blocks
    act_out = bb * L * D * f4                          # resident activation carry
    inter = (bb * L * 2 * D + 4 * bb * L * D + 2 * bb * L * L + bb * L * F) * f4
    est = 2 * weights + 2 * act_in + 2 * act_out + 2 * inter
    return int(min(max(est, 32 * 1024 * 1024), 128 * 1024 * 1024))


# ----------------------------------------------------------------------------
# Wrapper: single pallas_call over (batch_block, layer)
# ----------------------------------------------------------------------------
def transformer_justencoder_forward(src, mask, query_embed, pos_embed, packed, *,
                                    nhead, block_batch=None):
    """src/pos_embed: (B, L, D); mask: (B, L) nonzero == padded key.

    Returns `memory` (B, L, D); query_embed only feeds the (absent) decoder in the torch
    module, so it is unused here.
    """
    del query_embed
    B, L, D = src.shape
    NL = packed["wqk"].shape[0]
    F = packed["w1"].shape[-1]

    bb = B if block_batch is None else max(1, min(block_batch, B))
    while B % bb:
        bb -= 1

    kbias = jnp.where(mask.astype(jnp.bool_), -1e30, 0.0).astype(jnp.float32)
    kbias = kbias.reshape(B, 1, L)

    def act_spec(shape):
        nz = len(shape) - 1
        return pl.BlockSpec(shape, lambda b, l: (b,) + (0,) * nz)

    def wgt_spec(shape):
        nz = len(shape) - 1
        return pl.BlockSpec(shape, lambda b, l: (l,) + (0,) * nz)

    kernel = functools.partial(_encoder_stack_kernel, nhead=nhead)
    return pl.pallas_call(
        kernel,
        out_shape=jax.ShapeDtypeStruct((B, L, D), jnp.float32),
        grid_spec=pltpu.PrefetchScalarGridSpec(
            num_scalar_prefetch=0,
            grid=(B // bb, NL),
            in_specs=[
                act_spec((bb, L, D)),        # src (seeds the layer-0 activation)
                act_spec((bb, L, D)),        # positional embedding
                act_spec((bb, 1, L)),        # key-padding bias
                wgt_spec((1, D, 2 * D)),     # Wq|Wk (Q pre-scaled), bf16
                wgt_spec((1, D, D)),         # Wv, bf16
                wgt_spec((1, D, D)),         # Wo, bf16
                wgt_spec((1, D, F)),         # FFN linear1 weight, bf16
                wgt_spec((1, F, D)),         # FFN linear2 weight, bf16
                wgt_spec((1, 1, 2 * D)),     # bq|bk (Q pre-scaled), f32
                wgt_spec((1, 1, F)),         # FFN linear1 bias, f32
                wgt_spec((1, 7, D)),         # packed D-wide vectors, f32
            ],
            out_specs=pl.BlockSpec((bb, L, D), lambda b, l: (b, 0, 0)),
        ),
        compiler_params=pltpu.CompilerParams(
            dimension_semantics=("parallel", "arbitrary"),
            vmem_limit_bytes=_vmem_limit_bytes(bb, L, D, F)),
    )(src, pos_embed, kbias,
      packed["wqk"], packed["wv"], packed["wo"], packed["w1"], packed["w2"],
      packed["bqk"], packed["b1"], packed["dvec"])


# ----------------------------------------------------------------------------
# Parameters: raw (PyTorch-layout) weights + kernel-side packing
# ----------------------------------------------------------------------------
def make_raw_params(key, num_layers, d_model, nhead, dim_ff):
    raw = []
    for i in range(num_layers):
        ks = jax.random.split(jax.random.fold_in(key, i), 12)
        n = lambda k, shape, s=0.05: jax.random.normal(k, shape, jnp.float32) * s
        raw.append({
            "in_proj_w": n(ks[0], (3 * d_model, d_model)),   # torch MHA in_proj (out, in)
            "in_proj_b": n(ks[1], (3 * d_model,)),
            "out_proj_w": n(ks[2], (d_model, d_model)),      # (out, in)
            "out_proj_b": n(ks[3], (d_model,)),
            "lin1_w": n(ks[4], (dim_ff, d_model)),           # (out, in)
            "lin1_b": n(ks[5], (dim_ff,)),
            "lin2_w": n(ks[6], (d_model, dim_ff)),           # (out, in)
            "lin2_b": n(ks[7], (d_model,)),
            "ln1_g": 1.0 + n(ks[8], (d_model,)),
            "ln1_b": n(ks[9], (d_model,)),
            "ln2_g": 1.0 + n(ks[10], (d_model,)),
            "ln2_b": n(ks[11], (d_model,)),
        })
    return raw


def pack_params(raw, d_model, nhead, dim_ff):
    """Stack per-layer weights (layer-major) in the kernel layout; matmul weights in bf16."""
    D, F = d_model, dim_ff
    assert D % nhead == 0
    hd = D // nhead
    scale = 1.0 / (hd ** 0.5)

    wqk, wv, wo, w1, w2, bqk, b1, dvec = [], [], [], [], [], [], [], []
    for p in raw:
        w_in, b_in = p["in_proj_w"], p["in_proj_b"]
        wq_t = w_in[:D].T * scale          # fold 1/sqrt(hd) softmax scale into Q weights/bias
        wk_t = w_in[D:2 * D].T
        wqk.append(jnp.concatenate([wq_t, wk_t], axis=1))        # (D, 2D)
        wv.append(w_in[2 * D:].T)                                # (D, D)
        wo.append(p["out_proj_w"].T)                             # (D, D), rows head-major
        w1.append(p["lin1_w"].T)                                 # (D, F)
        w2.append(p["lin2_w"].T)                                 # (F, D)
        bqk.append(jnp.concatenate([b_in[:D] * scale, b_in[D:2 * D]])[None, :])
        b1.append(p["lin1_b"][None, :])
        dvec.append(jnp.stack([b_in[2 * D:], p["out_proj_b"], p["lin2_b"],
                               p["ln1_g"], p["ln1_b"], p["ln2_g"], p["ln2_b"]], axis=0))

    sbf = lambda xs: jnp.stack(xs, 0).astype(jnp.bfloat16)
    sf = lambda xs: jnp.stack(xs, 0).astype(jnp.float32)
    return {
        "wqk": sbf(wqk),   # (NL, D, 2D) bf16
        "wv":  sbf(wv),    # (NL, D, D)  bf16
        "wo":  sbf(wo),    # (NL, D, D)  bf16
        "w1":  sbf(w1),    # (NL, D, F)  bf16
        "w2":  sbf(w2),    # (NL, F, D)  bf16
        "bqk": sf(bqk),    # (NL, 1, 2D) f32
        "b1":  sf(b1),     # (NL, 1, F)  f32
        "dvec": sf(dvec),  # (NL, 7, D)  f32
    }


# ----------------------------------------------------------------------------
# Pure-JAX f32 reference (PyTorch-layout weights) for validation
# ----------------------------------------------------------------------------
def reference_forward(src, key_padding_mask, pos, raw_layers, *, nhead):
    B, L, D = src.shape
    hd = D // nhead
    kbias = jnp.where(key_padding_mask > 0, -1e30, 0.0).astype(jnp.float32)
    out = src
    for p in raw_layers:
        qk = out + pos
        w_in, b_in = p["in_proj_w"], p["in_proj_b"]
        Q = qk @ w_in[:D].T + b_in[:D]
        K = qk @ w_in[D:2 * D].T + b_in[D:2 * D]
        V = out @ w_in[2 * D:].T + b_in[2 * D:]
        Qh = Q.reshape(B, L, nhead, hd).transpose(0, 2, 1, 3)
        Kh = K.reshape(B, L, nhead, hd).transpose(0, 2, 1, 3)
        Vh = V.reshape(B, L, nhead, hd).transpose(0, 2, 1, 3)
        s = jnp.einsum("bhqd,bhkd->bhqk", Qh, Kh) / (hd ** 0.5)
        s = s + kbias[:, None, None, :]
        a = jax.nn.softmax(s, axis=-1)
        o = jnp.einsum("bhqk,bhkd->bhqd", a, Vh).transpose(0, 2, 1, 3).reshape(B, L, D)
        o = o @ p["out_proj_w"].T + p["out_proj_b"]
        y = out + o
        mu = y.mean(-1, keepdims=True)
        var = ((y - mu) ** 2).mean(-1, keepdims=True)
        y = (y - mu) * jax.lax.rsqrt(var + 1e-5) * p["ln1_g"] + p["ln1_b"]
        f = jnp.maximum(y @ p["lin1_w"].T + p["lin1_b"], 0.0) @ p["lin2_w"].T + p["lin2_b"]
        z = y + f
        mu2 = z.mean(-1, keepdims=True)
        var2 = ((z - mu2) ** 2).mean(-1, keepdims=True)
        out = (z - mu2) * jax.lax.rsqrt(var2 + 1e-5) * p["ln2_g"] + p["ln2_b"]
    return out


if __name__ == "__main__":
    # Small shapes consistent with the module's forward (batch-major (B, L, D)).
    B, L, D, NHEAD, FF, NLAYERS = 2, 8, 32, 4, 64, 2

    key = jax.random.PRNGKey(0)
    k1, k2, k3, k4 = jax.random.split(key, 4)
    src = jax.random.normal(k1, (B, L, D), jnp.float32)
    pos_embed = jax.random.normal(k2, (B, L, D), jnp.float32)
    query_embed = jax.random.normal(k4, (4, D), jnp.float32)   # unused by returned memory
    # torch key_padding_mask convention: nonzero == padded; pad last 2 keys of batch 1.
    mask = jnp.zeros((B, L), jnp.float32).at[1, L - 2:].set(1.0)

    raw = make_raw_params(k3, NLAYERS, D, NHEAD, FF)
    packed = pack_params(raw, D, NHEAD, FF)

    out = transformer_justencoder_forward(src, mask, query_embed, pos_embed, packed,
                                          nhead=NHEAD)
    out = jax.block_until_ready(out)

    ref = reference_forward(src, mask, pos_embed, raw, nhead=NHEAD)
    # Tolerance reflects the deliberate bf16-MXU + approximate-reciprocal precision trade;
    # statistics (softmax, LayerNorm, residual) are kept in f32.
    np.testing.assert_allclose(np.asarray(out), np.asarray(ref), rtol=2e-2, atol=2e-2)

    print("KERNEL_OK")
</pallas_src>

<mosaic_0001>
module attributes {stable_mosaic.version = 11 : i64} {
  func.func @_encoder_stack_kernel(%arg0: i32, %arg1: i32, %arg2: memref<2x8x32xf32, #tpu.memory_space<vmem>>, %arg3: memref<2x8x32xf32, #tpu.memory_space<vmem>>, %arg4: memref<2x1x8xf32, #tpu.memory_space<vmem>>, %arg5: memref<1x32x64xbf16, #tpu.memory_space<vmem>>, %arg6: memref<1x32x32xbf16, #tpu.memory_space<vmem>>, %arg7: memref<1x32x32xbf16, #tpu.memory_space<vmem>>, %arg8: memref<1x32x64xbf16, #tpu.memory_space<vmem>>, %arg9: memref<1x64x32xbf16, #tpu.memory_space<vmem>>, %arg10: memref<1x1x64xf32, #tpu.memory_space<vmem>>, %arg11: memref<1x1x64xf32, #tpu.memory_space<vmem>>, %arg12: memref<1x7x32xf32, #tpu.memory_space<vmem>>, %arg13: memref<2x8x32xf32, #tpu.memory_space<vmem>>) attributes {dimension_semantics = [#tpu.dimension_semantics<parallel>, #tpu.dimension_semantics<arbitrary>], iteration_bounds = array<i64: 1, 2>, scalar_prefetch = 0 : i64, scratch_operands = 0 : i64, tpu.core_type = #tpu.core_type<tc>, window_params = [{transform_indices = @transform_0, window_bounds = array<i64: 2, 8, 32>}, {transform_indices = @transform_1, window_bounds = array<i64: 2, 8, 32>}, {transform_indices = @transform_2, window_bounds = array<i64: 2, 1, 8>}, {transform_indices = @transform_3, window_bounds = array<i64: 1, 32, 64>}, {transform_indices = @transform_4, window_bounds = array<i64: 1, 32, 32>}, {transform_indices = @transform_5, window_bounds = array<i64: 1, 32, 32>}, {transform_indices = @transform_6, window_bounds = array<i64: 1, 32, 64>}, {transform_indices = @transform_7, window_bounds = array<i64: 1, 64, 32>}, {transform_indices = @transform_8, window_bounds = array<i64: 1, 1, 64>}, {transform_indices = @transform_9, window_bounds = array<i64: 1, 1, 64>}, {transform_indices = @transform_10, window_bounds = array<i64: 1, 7, 32>}, {transform_indices = @transform_11, window_bounds = array<i64: 2, 8, 32>}]} {
    %c0_i32 = arith.constant 0 : i32
    %0 = arith.cmpi eq, %arg1, %c0_i32 : i32
    %1 = arith.extui %0 : i1 to i32
    %c0_i32_0 = arith.constant 0 : i32
    %2 = arith.cmpi ne, %1, %c0_i32_0 : i32
    scf.if %2 {
      %c0_71 = arith.constant 0 : index
      %c0_72 = arith.constant 0 : index
      %c0_73 = arith.constant 0 : index
      %210 = vector.load %arg2[%c0_71, %c0_72, %c0_73] : memref<2x8x32xf32, #tpu.memory_space<vmem>>, vector<2x8x32xf32>
      %c0_74 = arith.constant 0 : index
      %c0_75 = arith.constant 0 : index
      %c0_76 = arith.constant 0 : index
      %211 = vector.load %arg13[%c0_74, %c0_75, %c0_76] : memref<2x8x32xf32, #tpu.memory_space<vmem>>, vector<2x8x32xf32>
      tpu.vector_store %arg13[%c0_74, %c0_75, %c0_76], %210 {strides = array<i32>} : memref<2x8x32xf32, #tpu.memory_space<vmem>>, vector<2x8x32xf32>,
    } else {
    }
    %c0 = arith.constant 0 : index
    %c0_1 = arith.constant 0 : index
    %c0_2 = arith.constant 0 : index
    %3 = vector.load %arg13[%c0, %c0_1, %c0_2] : memref<2x8x32xf32, #tpu.memory_space<vmem>>, vector<2x8x32xf32>
    %c0_3 = arith.constant 0 : index
    %c0_4 = arith.constant 0 : index
    %c0_5 = arith.constant 0 : index
    %4 = vector.load %arg4[%c0_3, %c0_4, %c0_5] : memref<2x1x8xf32, #tpu.memory_space<vmem>>, vector<2x1x8xf32>
    %c0_6 = arith.constant 0 : index
    %c0_7 = arith.constant 0 : index
    %c0_8 = arith.constant 0 : index
    %5 = vector.load %arg5[%c0_6, %c0_7, %c0_8] : memref<1x32x64xbf16, #tpu.memory_space<vmem>>, vector<1x32x64xbf16>
    %6 = vector.shape_cast %5 : vector<1x32x64xbf16> to vector<32x64xbf16>
    %c0_9 = arith.constant 0 : index
    %c0_10 = arith.constant 0 : index
    %c0_11 = arith.constant 0 : index
    %7 = vector.load %arg6[%c0_9, %c0_10, %c0_11] : memref<1x32x32xbf16, #tpu.memory_space<vmem>>, vector<1x32x32xbf16>
    %8 = vector.shape_cast %7 : vector<1x32x32xbf16> to vector<32x32xbf16>
    %c0_12 = arith.constant 0 : index
    %c0_13 = arith.constant 0 : index
    %c0_14 = arith.constant 0 : index
    %9 = vector.load %arg7[%c0_12, %c0_13, %c0_14] : memref<1x32x32xbf16, #tpu.memory_space<vmem>>, vector<1x32x32xbf16>
    %10 = vector.shape_cast %9 : vector<1x32x32xbf16> to vector<32x32xbf16>
    %c0_15 = arith.constant 0 : index
    %c0_16 = arith.constant 0 : index
    %c0_17 = arith.constant 0 : index
    %11 = vector.load %arg8[%c0_15, %c0_16, %c0_17] : memref<1x32x64xbf16, #tpu.memory_space<vmem>>, vector<1x32x64xbf16>
    %12 = vector.shape_cast %11 : vector<1x32x64xbf16> to vector<32x64xbf16>
    %c0_18 = arith.constant 0 : index
    %c0_19 = arith.constant 0 : index
    %c0_20 = arith.constant 0 : index
    %13 = vector.load %arg9[%c0_18, %c0_19, %c0_20] : memref<1x64x32xbf16, #tpu.memory_space<vmem>>, vector<1x64x32xbf16>
    %14 = vector.shape_cast %13 : vector<1x64x32xbf16> to vector<64x32xbf16>
    %c0_21 = arith.constant 0 : index
    %c0_22 = arith.constant 0 : index
    %c0_23 = arith.constant 0 : index
    %15 = vector.load %arg10[%c0_21, %c0_22, %c0_23] : memref<1x1x64xf32, #tpu.memory_space<vmem>>, vector<1x1x64xf32>
    %16 = vector.shape_cast %15 : vector<1x1x64xf32> to vector<1x64xf32>
    %c0_24 = arith.constant 0 : index
    %c0_25 = arith.constant 0 : index
    %c0_26 = arith.constant 0 : index
    %17 = vector.load %arg11[%c0_24, %c0_25, %c0_26] : memref<1x1x64xf32, #tpu.memory_space<vmem>>, vector<1x1x64xf32>
    %18 = vector.shape_cast %17 : vector<1x1x64xf32> to vector<1x64xf32>
    %c0_27 = arith.constant 0 : index
    %c0_28 = arith.constant 0 : index
    %c0_29 = arith.constant 0 : index
    %19 = vector.load %arg12[%c0_27, %c0_28, %c0_29] : memref<1x7x32xf32, #tpu.memory_space<vmem>>, vector<1x7x32xf32>
    %20 = vector.shape_cast %19 : vector<1x7x32xf32> to vector<7x32xf32>
    %21 = vector.extract_strided_slice %20 {offsets = [0, 0], sizes = [1, 32], strides = [1, 1]} : vector<7x32xf32> to vector<1x32xf32>
    %22 = vector.extract_strided_slice %20 {offsets = [1, 0], sizes = [1, 32], strides = [1, 1]} : vector<7x32xf32> to vector<1x32xf32>
    %23 = vector.extract_strided_slice %20 {offsets = [2, 0], sizes = [1, 32], strides = [1, 1]} : vector<7x32xf32> to vector<1x32xf32>
    %24 = vector.extract_strided_slice %20 {offsets = [3, 0], sizes = [1, 32], strides = [1, 1]} : vector<7x32xf32> to vector<1x32xf32>
    %25 = vector.extract_strided_slice %20 {offsets = [4, 0], sizes = [1, 32], strides = [1, 1]} : vector<7x32xf32> to vector<1x32xf32>
    %26 = vector.extract_strided_slice %20 {offsets = [5, 0], sizes = [1, 32], strides = [1, 1]} : vector<7x32xf32> to vector<1x32xf32>
    %27 = vector.extract_strided_slice %20 {offsets = [6, 0], sizes = [1, 32], strides = [1, 1]} : vector<7x32xf32> to vector<1x32xf32>
    %28 = vector.shape_cast %3 : vector<2x8x32xf32> to vector<16x32xf32>
    %c0_30 = arith.constant 0 : index
    %c0_31 = arith.constant 0 : index
    %c0_32 = arith.constant 0 : index
    %29 = vector.load %arg3[%c0_30, %c0_31, %c0_32] : memref<2x8x32xf32, #tpu.memory_space<vmem>>, vector<2x8x32xf32>
    %30 = arith.addf %3, %29 : vector<2x8x32xf32>
    %31 = vector.shape_cast %30 : vector<2x8x32xf32> to vector<16x32xf32>
    %32 = arith.truncf %31 : vector<16x32xf32> to vector<16x32xbf16>
    %cst = arith.constant dense<0.000000e+00> : vector<16x64xf32>
    %33 = tpu.matmul %32, %6, %cst {dimension_numbers = #tpu.dot_dimension_numbers<[1], [0], [0], [1], [0, 0, 1, 1], [], []>} : vector<16x32xbf16>, vector<32x64xbf16>, vector<16x64xf32> -> vector<16x64xf32>
    %34 = vector.broadcast %16 : vector<1x64xf32> to vector<16x64xf32>
    %35 = arith.addf %33, %34 : vector<16x64xf32>
    %36 = arith.truncf %28 : vector<16x32xf32> to vector<16x32xbf16>
    %cst_33 = arith.constant dense<0.000000e+00> : vector<16x32xf32>
    %37 = tpu.matmul %36, %8, %cst_33 {dimension_numbers = #tpu.dot_dimension_numbers<[1], [0], [0], [1], [0, 0, 1, 1], [], []>} : vector<16x32xbf16>, vector<32x32xbf16>, vector<16x32xf32> -> vector<16x32xf32>
    %38 = vector.broadcast %21 : vector<1x32xf32> to vector<16x32xf32>
    %39 = arith.addf %37, %38 : vector<16x32xf32>
    %40 = vector.extract_strided_slice %35 {offsets = [0, 0], sizes = [16, 32], strides = [1, 1]} : vector<16x64xf32> to vector<16x32xf32>
    %41 = vector.shape_cast %40 : vector<16x32xf32> to vector<2x8x32xf32>
    %42 = vector.extract_strided_slice %35 {offsets = [0, 32], sizes = [16, 32], strides = [1, 1]} : vector<16x64xf32> to vector<16x32xf32>
    %43 = vector.shape_cast %42 : vector<16x32xf32> to vector<2x8x32xf32>
    %44 = vector.shape_cast %39 : vector<16x32xf32> to vector<2x8x32xf32>
    %cst_34 = arith.constant 0.000000e+00 : f32
    %45 = vector.broadcast %cst_34 : f32 to vector<16x32xf32>
    %46 = vector.extract_strided_slice %41 {offsets = [0, 0, 0], sizes = [2, 8, 8], strides = [1, 1, 1]} : vector<2x8x32xf32> to vector<2x8x8xf32>
    %47 = arith.truncf %46 : vector<2x8x8xf32> to vector<2x8x8xbf16>
    %48 = vector.extract_strided_slice %43 {offsets = [0, 0, 0], sizes = [2, 8, 8], strides = [1, 1, 1]} : vector<2x8x32xf32> to vector<2x8x8xf32>
    %49 = arith.truncf %48 : vector<2x8x8xf32> to vector<2x8x8xbf16>
    %50 = vector.extract_strided_slice %44 {offsets = [0, 0, 0], sizes = [2, 8, 8], strides = [1, 1, 1]} : vector<2x8x32xf32> to vector<2x8x8xf32>
    %51 = arith.truncf %50 : vector<2x8x8xf32> to vector<2x8x8xbf16>
    %cst_35 = arith.constant dense<0.000000e+00> : vector<2x8x8xf32>
    %52 = tpu.matmul %47, %49, %cst_35 {dimension_numbers = #tpu.dot_dimension_numbers<[2], [2], [1], [1], [0, 0, 0, 1, 1, 1], [0], [0]>} : vector<2x8x8xbf16>, vector<2x8x8xbf16>, vector<2x8x8xf32> -> vector<2x8x8xf32>
    %53 = vector.broadcast %4 : vector<2x1x8xf32> to vector<2x8x8xf32>
    %54 = arith.addf %52, %53 : vector<2x8x8xf32>
    %cst_36 = arith.constant dense<0xFF800000> : vector<2x8xf32>
    %55 = vector.multi_reduction <maximumf>, %54, %cst_36 [2] : vector<2x8x8xf32> to vector<2x8xf32>
    %56 = vector.shape_cast %55 : vector<2x8xf32> to vector<2x8x1xf32>
    %57 = vector.broadcast %56 : vector<2x8x1xf32> to vector<2x8x8xf32>
    %58 = arith.subf %54, %57 : vector<2x8x8xf32>
    %59 = math.exp %58 : vector<2x8x8xf32>
    %cst_37 = arith.constant dense<0.000000e+00> : vector<2x8xf32>
    %60 = vector.multi_reduction <add>, %59, %cst_37 [2] : vector<2x8x8xf32> to vector<2x8xf32>
    %61 = vector.shape_cast %60 : vector<2x8xf32> to vector<2x8x1xf32>
    %62 = tpu.reciprocal %61 {approx = true} : vector<2x8x1xf32> -> vector<2x8x1xf32>
    %63 = vector.broadcast %62 : vector<2x8x1xf32> to vector<2x8x8xf32>
    %64 = arith.mulf %59, %63 : vector<2x8x8xf32>
    %65 = arith.truncf %64 : vector<2x8x8xf32> to vector<2x8x8xbf16>
    %cst_38 = arith.constant dense<0.000000e+00> : vector<2x8x8xf32>
    %66 = tpu.matmul %65, %51, %cst_38 {dimension_numbers = #tpu.dot_dimension_numbers<[2], [1], [1], [2], [0, 0, 0, 1, 1, 2], [0], [0]>} : vector<2x8x8xbf16>, vector<2x8x8xbf16>, vector<2x8x8xf32> -> vector<2x8x8xf32>
    %67 = vector.shape_cast %66 : vector<2x8x8xf32> to vector<16x8xf32>
    %68 = arith.truncf %67 : vector<16x8xf32> to vector<16x8xbf16>
    %69 = vector.extract_strided_slice %10 {offsets = [0, 0], sizes = [8, 32], strides = [1, 1]} : vector<32x32xbf16> to vector<8x32xbf16>
    %cst_39 = arith.constant dense<0.000000e+00> : vector<16x32xf32>
    %70 = tpu.matmul %68, %69, %cst_39 {dimension_numbers = #tpu.dot_dimension_numbers<[1], [0], [0], [1], [0, 0, 1, 1], [], []>} : vector<16x8xbf16>, vector<8x32xbf16>, vector<16x32xf32> -> vector<16x32xf32>
    %71 = arith.addf %45, %70 : vector<16x32xf32>
    %72 = vector.extract_strided_slice %41 {offsets = [0, 0, 8], sizes = [2, 8, 8], strides = [1, 1, 1]} : vector<2x8x32xf32> to vector<2x8x8xf32>
    %73 = arith.truncf %72 : vector<2x8x8xf32> to vector<2x8x8xbf16>
    %74 = vector.extract_strided_slice %43 {offsets = [0, 0, 8], sizes = [2, 8, 8], strides = [1, 1, 1]} : vector<2x8x32xf32> to vector<2x8x8xf32>
    %75 = arith.truncf %74 : vector<2x8x8xf32> to vector<2x8x8xbf16>
    %76 = vector.extract_strided_slice %44 {offsets = [0, 0, 8], sizes = [2, 8, 8], strides = [1, 1, 1]} : vector<2x8x32xf32> to vector<2x8x8xf32>
    %77 = arith.truncf %76 : vector<2x8x8xf32> to vector<2x8x8xbf16>
    %cst_40 = arith.constant dense<0.000000e+00> : vector<2x8x8xf32>
    %78 = tpu.matmul %73, %75, %cst_40 {dimension_numbers = #tpu.dot_dimension_numbers<[2], [2], [1], [1], [0, 0, 0, 1, 1, 1], [0], [0]>} : vector<2x8x8xbf16>, vector<2x8x8xbf16>, vector<2x8x8xf32> -> vector<2x8x8xf32>
    %79 = vector.broadcast %4 : vector<2x1x8xf32> to vector<2x8x8xf32>
    %80 = arith.addf %78, %79 : vector<2x8x8xf32>
    %cst_41 = arith.constant dense<0xFF800000> : vector<2x8xf32>
    %81 = vector.multi_reduction <maximumf>, %80, %cst_41 [2] : vector<2x8x8xf32> to vector<2x8xf32>
    %82 = vector.shape_cast %81 : vector<2x8xf32> to vector<2x8x1xf32>
    %83 = vector.broadcast %82 : vector<2x8x1xf32> to vector<2x8x8xf32>
    %84 = arith.subf %80, %83 : vector<2x8x8xf32>
    %85 = math.exp %84 : vector<2x8x8xf32>
    %cst_42 = arith.constant dense<0.000000e+00> : vector<2x8xf32>
    %86 = vector.multi_reduction <add>, %85, %cst_42 [2] : vector<2x8x8xf32> to vector<2x8xf32>
    %87 = vector.shape_cast %86 : vector<2x8xf32> to vector<2x8x1xf32>
    %88 = tpu.reciprocal %87 {approx = true} : vector<2x8x1xf32> -> vector<2x8x1xf32>
    %89 = vector.broadcast %88 : vector<2x8x1xf32> to vector<2x8x8xf32>
    %90 = arith.mulf %85, %89 : vector<2x8x8xf32>
    %91 = arith.truncf %90 : vector<2x8x8xf32> to vector<2x8x8xbf16>
    %cst_43 = arith.constant dense<0.000000e+00> : vector<2x8x8xf32>
    %92 = tpu.matmul %91, %77, %cst_43 {dimension_numbers = #tpu.dot_dimension_numbers<[2], [1], [1], [2], [0, 0, 0, 1, 1, 2], [0], [0]>} : vector<2x8x8xbf16>, vector<2x8x8xbf16>, vector<2x8x8xf32> -> vector<2x8x8xf32>
    %93 = vector.shape_cast %92 : vector<2x8x8xf32> to vector<16x8xf32>
    %94 = arith.truncf %93 : vector<16x8xf32> to vector<16x8xbf16>
    %95 = vector.extract_strided_slice %10 {offsets = [8, 0], sizes = [8, 32], strides = [1, 1]} : vector<32x32xbf16> to vector<8x32xbf16>
    %cst_44 = arith.constant dense<0.000000e+00> : vector<16x32xf32>
    %96 = tpu.matmul %94, %95, %cst_44 {dimension_numbers = #tpu.dot_dimension_numbers<[1], [0], [0], [1], [0, 0, 1, 1], [], []>} : vector<16x8xbf16>, vector<8x32xbf16>, vector<16x32xf32> -> vector<16x32xf32>
    %97 = arith.addf %71, %96 : vector<16x32xf32>
    %98 = vector.extract_strided_slice %41 {offsets = [0, 0, 16], sizes = [2, 8, 8], strides = [1, 1, 1]} : vector<2x8x32xf32> to vector<2x8x8xf32>
    %99 = arith.truncf %98 : vector<2x8x8xf32> to vector<2x8x8xbf16>
    %100 = vector.extract_strided_slice %43 {offsets = [0, 0, 16], sizes = [2, 8, 8], strides = [1, 1, 1]} : vector<2x8x32xf32> to vector<2x8x8xf32>
    %101 = arith.truncf %100 : vector<2x8x8xf32> to vector<2x8x8xbf16>
    %102 = vector.extract_strided_slice %44 {offsets = [0, 0, 16], sizes = [2, 8, 8], strides = [1, 1, 1]} : vector<2x8x32xf32> to vector<2x8x8xf32>
    %103 = arith.truncf %102 : vector<2x8x8xf32> to vector<2x8x8xbf16>
    %cst_45 = arith.constant dense<0.000000e+00> : vector<2x8x8xf32>
    %104 = tpu.matmul %99, %101, %cst_45 {dimension_numbers = #tpu.dot_dimension_numbers<[2], [2], [1], [1], [0, 0, 0, 1, 1, 1], [0], [0]>} : vector<2x8x8xbf16>, vector<2x8x8xbf16>, vector<2x8x8xf32> -> vector<2x8x8xf32>
    %105 = vector.broadcast %4 : vector<2x1x8xf32> to vector<2x8x8xf32>
    %106 = arith.addf %104, %105 : vector<2x8x8xf32>
    %cst_46 = arith.constant dense<0xFF800000> : vector<2x8xf32>
    %107 = vector.multi_reduction <maximumf>, %106, %cst_46 [2] : vector<2x8x8xf32> to vector<2x8xf32>
    %108 = vector.shape_cast %107 : vector<2x8xf32> to vector<2x8x1xf32>
    %109 = vector.broadcast %108 : vector<2x8x1xf32> to vector<2x8x8xf32>
    %110 = arith.subf %106, %109 : vector<2x8x8xf32>
    %111 = math.exp %110 : vector<2x8x8xf32>
    %cst_47 = arith.constant dense<0.000000e+00> : vector<2x8xf32>
    %112 = vector.multi_reduction <add>, %111, %cst_47 [2] : vector<2x8x8xf32> to vector<2x8xf32>
    %113 = vector.shape_cast %112 : vector<2x8xf32> to vector<2x8x1xf32>
    %114 = tpu.reciprocal %113 {approx = true} : vector<2x8x1xf32> -> vector<2x8x1xf32>
    %115 = vector.broadcast %114 : vector<2x8x1xf32> to vector<2x8x8xf32>
    %116 = arith.mulf %111, %115 : vector<2x8x8xf32>
    %117 = arith.truncf %116 : vector<2x8x8xf32> to vector<2x8x8xbf16>
    %cst_48 = arith.constant dense<0.000000e+00> : vector<2x8x8xf32>
    %118 = tpu.matmul %117, %103, %cst_48 {dimension_numbers = #tpu.dot_dimension_numbers<[2], [1], [1], [2], [0, 0, 0, 1, 1, 2], [0], [0]>} : vector<2x8x8xbf16>, vector<2x8x8xbf16>, vector<2x8x8xf32> -> vector<2x8x8xf32>
    %119 = vector.shape_cast %118 : vector<2x8x8xf32> to vector<16x8xf32>
    %120 = arith.truncf %119 : vector<16x8xf32> to vector<16x8xbf16>
    %121 = vector.extract_strided_slice %10 {offsets = [16, 0], sizes = [8, 32], strides = [1, 1]} : vector<32x32xbf16> to vector<8x32xbf16>
    %cst_49 = arith.constant dense<0.000000e+00> : vector<16x32xf32>
    %122 = tpu.matmul %120, %121, %cst_49 {dimension_numbers = #tpu.dot_dimension_numbers<[1], [0], [0], [1], [0, 0, 1, 1], [], []>} : vector<16x8xbf16>, vector<8x32xbf16>, vector<16x32xf32> -> vector<16x32xf32>
    %123 = arith.addf %97, %122 : vector<16x32xf32>
    %124 = vector.extract_strided_slice %41 {offsets = [0, 0, 24], sizes = [2, 8, 8], strides = [1, 1, 1]} : vector<2x8x32xf32> to vector<2x8x8xf32>
    %125 = arith.truncf %124 : vector<2x8x8xf32> to vector<2x8x8xbf16>
    %126 = vector.extract_strided_slice %43 {offsets = [0, 0, 24], sizes = [2, 8, 8], strides = [1, 1, 1]} : vector<2x8x32xf32> to vector<2x8x8xf32>
    %127 = arith.truncf %126 : vector<2x8x8xf32> to vector<2x8x8xbf16>
    %128 = vector.extract_strided_slice %44 {offsets = [0, 0, 24], sizes = [2, 8, 8], strides = [1, 1, 1]} : vector<2x8x32xf32> to vector<2x8x8xf32>
    %129 = arith.truncf %128 : vector<2x8x8xf32> to vector<2x8x8xbf16>
    %cst_50 = arith.constant dense<0.000000e+00> : vector<2x8x8xf32>
    %130 = tpu.matmul %125, %127, %cst_50 {dimension_numbers = #tpu.dot_dimension_numbers<[2], [2], [1], [1], [0, 0, 0, 1, 1, 1], [0], [0]>} : vector<2x8x8xbf16>, vector<2x8x8xbf16>, vector<2x8x8xf32> -> vector<2x8x8xf32>
    %131 = vector.broadcast %4 : vector<2x1x8xf32> to vector<2x8x8xf32>
    %132 = arith.addf %130, %131 : vector<2x8x8xf32>
    %cst_51 = arith.constant dense<0xFF800000> : vector<2x8xf32>
    %133 = vector.multi_reduction <maximumf>, %132, %cst_51 [2] : vector<2x8x8xf32> to vector<2x8xf32>
    %134 = vector.shape_cast %133 : vector<2x8xf32> to vector<2x8x1xf32>
    %135 = vector.broadcast %134 : vector<2x8x1xf32> to vector<2x8x8xf32>
    %136 = arith.subf %132, %135 : vector<2x8x8xf32>
    %137 = math.exp %136 : vector<2x8x8xf32>
    %cst_52 = arith.constant dense<0.000000e+00> : vector<2x8xf32>
    %138 = vector.multi_reduction <add>, %137, %cst_52 [2] : vector<2x8x8xf32> to vector<2x8xf32>
    %139 = vector.shape_cast %138 : vector<2x8xf32> to vector<2x8x1xf32>
    %140 = tpu.reciprocal %139 {approx = true} : vector<2x8x1xf32> -> vector<2x8x1xf32>
    %141 = vector.broadcast %140 : vector<2x8x1xf32> to vector<2x8x8xf32>
    %142 = arith.mulf %137, %141 : vector<2x8x8xf32>
    %143 = arith.truncf %142 : vector<2x8x8xf32> to vector<2x8x8xbf16>
    %cst_53 = arith.constant dense<0.000000e+00> : vector<2x8x8xf32>
    %144 = tpu.matmul %143, %129, %cst_53 {dimension_numbers = #tpu.dot_dimension_numbers<[2], [1], [1], [2], [0, 0, 0, 1, 1, 2], [0], [0]>} : vector<2x8x8xbf16>, vector<2x8x8xbf16>, vector<2x8x8xf32> -> vector<2x8x8xf32>
    %145 = vector.shape_cast %144 : vector<2x8x8xf32> to vector<16x8xf32>
    %146 = arith.truncf %145 : vector<16x8xf32> to vector<16x8xbf16>
    %147 = vector.extract_strided_slice %10 {offsets = [24, 0], sizes = [8, 32], strides = [1, 1]} : vector<32x32xbf16> to vector<8x32xbf16>
    %cst_54 = arith.constant dense<0.000000e+00> : vector<16x32xf32>
    %148 = tpu.matmul %146, %147, %cst_54 {dimension_numbers = #tpu.dot_dimension_numbers<[1], [0], [0], [1], [0, 0, 1, 1], [], []>} : vector<16x8xbf16>, vector<8x32xbf16>, vector<16x32xf32> -> vector<16x32xf32>
    %149 = arith.addf %123, %148 : vector<16x32xf32>
    %150 = vector.broadcast %22 : vector<1x32xf32> to vector<16x32xf32>
    %151 = arith.addf %149, %150 : vector<16x32xf32>
    %152 = arith.addf %28, %151 : vector<16x32xf32>
    %cst_55 = arith.constant dense<0.000000e+00> : vector<16xf32>
    %153 = vector.multi_reduction <add>, %152, %cst_55 [1] : vector<16x32xf32> to vector<16xf32>
    %154 = vector.shape_cast %153 : vector<16xf32> to vector<16x1xf32>
    %cst_56 = arith.constant 3.200000e+01 : f32
    %155 = vector.broadcast %cst_56 : f32 to vector<16x1xf32>
    %156 = arith.divf %154, %155 : vector<16x1xf32>
    %157 = vector.broadcast %156 : vector<16x1xf32> to vector<16x32xf32>
    %158 = arith.subf %152, %157 : vector<16x32xf32>
    %159 = arith.mulf %158, %158 : vector<16x32xf32>
    %cst_57 = arith.constant dense<0.000000e+00> : vector<16xf32>
    %160 = vector.multi_reduction <add>, %159, %cst_57 [1] : vector<16x32xf32> to vector<16xf32>
    %161 = vector.shape_cast %160 : vector<16xf32> to vector<16x1xf32>
    %cst_58 = arith.constant 3.200000e+01 : f32
    %162 = vector.broadcast %cst_58 : f32 to vector<16x1xf32>
    %163 = arith.divf %161, %162 : vector<16x1xf32>
    %164 = vector.broadcast %156 : vector<16x1xf32> to vector<16x32xf32>
    %165 = arith.subf %152, %164 : vector<16x32xf32>
    %cst_59 = arith.constant 9.99999974E-6 : f32
    %166 = vector.broadcast %cst_59 : f32 to vector<16x1xf32>
    %167 = arith.addf %163, %166 : vector<16x1xf32>
    %168 = math.rsqrt %167 : vector<16x1xf32>
    %169 = vector.broadcast %168 : vector<16x1xf32> to vector<16x32xf32>
    %170 = arith.mulf %165, %169 : vector<16x32xf32>
    %171 = vector.broadcast %24 : vector<1x32xf32> to vector<16x32xf32>
    %172 = arith.mulf %170, %171 : vector<16x32xf32>
    %173 = vector.broadcast %25 : vector<1x32xf32> to vector<16x32xf32>
    %174 = arith.addf %172, %173 : vector<16x32xf32>
    %175 = arith.truncf %174 : vector<16x32xf32> to vector<16x32xbf16>
    %cst_60 = arith.constant dense<0.000000e+00> : vector<16x64xf32>
    %176 = tpu.matmul %175, %12, %cst_60 {dimension_numbers = #tpu.dot_dimension_numbers<[1], [0], [0], [1], [0, 0, 1, 1], [], []>} : vector<16x32xbf16>, vector<32x64xbf16>, vector<16x64xf32> -> vector<16x64xf32>
    %177 = vector.broadcast %18 : vector<1x64xf32> to vector<16x64xf32>
    %178 = arith.addf %176, %177 : vector<16x64xf32>
    %cst_61 = arith.constant 0.000000e+00 : f32
    %179 = vector.broadcast %cst_61 : f32 to vector<16x64xf32>
    %180 = arith.maximumf %178, %179 : vector<16x64xf32>
    %181 = arith.truncf %180 : vector<16x64xf32> to vector<16x64xbf16>
    %cst_62 = arith.constant dense<0.000000e+00> : vector<16x32xf32>
    %182 = tpu.matmul %181, %14, %cst_62 {dimension_numbers = #tpu.dot_dimension_numbers<[1], [0], [0], [1], [0, 0, 1, 1], [], []>} : vector<16x64xbf16>, vector<64x32xbf16>, vector<16x32xf32> -> vector<16x32xf32>
    %183 = vector.broadcast %23 : vector<1x32xf32> to vector<16x32xf32>
    %184 = arith.addf %182, %183 : vector<16x32xf32>
    %185 = arith.addf %174, %184 : vector<16x32xf32>
    %cst_63 = arith.constant dense<0.000000e+00> : vector<16xf32>
    %186 = vector.multi_reduction <add>, %185, %cst_63 [1] : vector<16x32xf32> to vector<16xf32>
    %187 = vector.shape_cast %186 : vector<16xf32> to vector<16x1xf32>
    %cst_64 = arith.constant 3.200000e+01 : f32
    %188 = vector.broadcast %cst_64 : f32 to vector<16x1xf32>
    %189 = arith.divf %187, %188 : vector<16x1xf32>
    %190 = vector.broadcast %189 : vector<16x1xf32> to vector<16x32xf32>
    %191 = arith.subf %185, %190 : vector<16x32xf32>
    %192 = arith.mulf %191, %191 : vector<16x32xf32>
    %cst_65 = arith.constant dense<0.000000e+00> : vector<16xf32>
    %193 = vector.multi_reduction <add>, %192, %cst_65 [1] : vector<16x32xf32> to vector<16xf32>
    %194 = vector.shape_cast %193 : vector<16xf32> to vector<16x1xf32>
    %cst_66 = arith.constant 3.200000e+01 : f32
    %195 = vector.broadcast %cst_66 : f32 to vector<16x1xf32>
    %196 = arith.divf %194, %195 : vector<16x1xf32>
    %197 = vector.broadcast %189 : vector<16x1xf32> to vector<16x32xf32>
    %198 = arith.subf %185, %197 : vector<16x32xf32>
    %cst_67 = arith.constant 9.99999974E-6 : f32
    %199 = vector.broadcast %cst_67 : f32 to vector<16x1xf32>
    %200 = arith.addf %196, %199 : vector<16x1xf32>
    %201 = math.rsqrt %200 : vector<16x1xf32>
    %202 = vector.broadcast %201 : vector<16x1xf32> to vector<16x32xf32>
    %203 = arith.mulf %198, %202 : vector<16x32xf32>
    %204 = vector.broadcast %26 : vector<1x32xf32> to vector<16x32xf32>
    %205 = arith.mulf %203, %204 : vector<16x32xf32>
    %206 = vector.broadcast %27 : vector<1x32xf32> to vector<16x32xf32>
    %207 = arith.addf %205, %206 : vector<16x32xf32>
    %208 = vector.shape_cast %207 : vector<16x32xf32> to vector<2x8x32xf32>
    %c0_68 = arith.constant 0 : index
    %c0_69 = arith.constant 0 : index
    %c0_70 = arith.constant 0 : index
    %209 = vector.load %arg13[%c0_68, %c0_69, %c0_70] : memref<2x8x32xf32, #tpu.memory_space<vmem>>, vector<2x8x32xf32>
    tpu.vector_store %arg13[%c0_68, %c0_69, %c0_70], %208 {strides = array<i32>} : memref<2x8x32xf32, #tpu.memory_space<vmem>>, vector<2x8x32xf32>,
    return
  }
  func.func @transform_0(%arg0: i32, %arg1: i32) -> (i32, i32, i32) {
    %c0_i32 = arith.constant 0 : i32
    %c0_i32_0 = arith.constant 0 : i32
    %c0_i32_1 = arith.constant 0 : i32
    return %arg0, %c0_i32, %c0_i32_0 : i32, i32, i32
  }
  func.func @transform_1(%arg0: i32, %arg1: i32) -> (i32, i32, i32) {
    %c0_i32 = arith.constant 0 : i32
    %c0_i32_0 = arith.constant 0 : i32
    %c0_i32_1 = arith.constant 0 : i32
    return %arg0, %c0_i32, %c0_i32_0 : i32, i32, i32
  }
  func.func @transform_2(%arg0: i32, %arg1: i32) -> (i32, i32, i32) {
    %c0_i32 = arith.constant 0 : i32
    %c0_i32_0 = arith.constant 0 : i32
    %c0_i32_1 = arith.constant 0 : i32
    return %arg0, %c0_i32, %c0_i32_0 : i32, i32, i32
  }
  func.func @transform_3(%arg0: i32, %arg1: i32) -> (i32, i32, i32) {
    %c0_i32 = arith.constant 0 : i32
    %c0_i32_0 = arith.constant 0 : i32
    %c0_i32_1 = arith.constant 0 : i32
    return %arg1, %c0_i32, %c0_i32_0 : i32, i32, i32
  }
  func.func @transform_4(%arg0: i32, %arg1: i32) -> (i32, i32, i32) {
    %c0_i32 = arith.constant 0 : i32
    %c0_i32_0 = arith.constant 0 : i32
    %c0_i32_1 = arith.constant 0 : i32
    return %arg1, %c0_i32, %c0_i32_0 : i32, i32, i32
  }
  func.func @transform_5(%arg0: i32, %arg1: i32) -> (i32, i32, i32) {
    %c0_i32 = arith.constant 0 : i32
    %c0_i32_0 = arith.constant 0 : i32
    %c0_i32_1 = arith.constant 0 : i32
    return %arg1, %c0_i32, %c0_i32_0 : i32, i32, i32
  }
  func.func @transform_6(%arg0: i32, %arg1: i32) -> (i32, i32, i32) {
    %c0_i32 = arith.constant 0 : i32
    %c0_i32_0 = arith.constant 0 : i32
    %c0_i32_1 = arith.constant 0 : i32
    return %arg1, %c0_i32, %c0_i32_0 : i32, i32, i32
  }
  func.func @transform_7(%arg0: i32, %arg1: i32) -> (i32, i32, i32) {
    %c0_i32 = arith.constant 0 : i32
    %c0_i32_0 = arith.constant 0 : i32
    %c0_i32_1 = arith.constant 0 : i32
    return %arg1, %c0_i32, %c0_i32_0 : i32, i32, i32
  }
  func.func @transform_8(%arg0: i32, %arg1: i32) -> (i32, i32, i32) {
    %c0_i32 = arith.constant 0 : i32
    %c0_i32_0 = arith.constant 0 : i32
    %c0_i32_1 = arith.constant 0 : i32
    return %arg1, %c0_i32, %c0_i32_0 : i32, i32, i32
  }
  func.func @transform_9(%arg0: i32, %arg1: i32) -> (i32, i32, i32) {
    %c0_i32 = arith.constant 0 : i32
    %c0_i32_0 = arith.constant 0 : i32
    %c0_i32_1 = arith.constant 0 : i32
    return %arg1, %c0_i32, %c0_i32_0 : i32, i32, i32
  }
  func.func @transform_10(%arg0: i32, %arg1: i32) -> (i32, i32, i32) {
    %c0_i32 = arith.constant 0 : i32
    %c0_i32_0 = arith.constant 0 : i32
    %c0_i32_1 = arith.constant 0 : i32
    return %arg1, %c0_i32, %c0_i32_0 : i32, i32, i32
  }
  func.func @transform_11(%arg0: i32, %arg1: i32) -> (i32, i32, i32) {
    %c0_i32 = arith.constant 0 : i32
    %c0_i32_0 = arith.constant 0 : i32
    %c0_i32_1 = arith.constant 0 : i32
    return %arg0, %c0_i32, %c0_i32_0 : i32, i32, i32
  }
}

</mosaic_0001>

<bundles_post_ra>
// kernel: tpu_custom_call.1
= control target key start
LH: loop header
LB: loop body
LE: loop exit
PB: predicated region body
PF: predicated region fallthrough
CT: control target
= control target key end

     0   :  { %s3626_s0 = inlined_call_operand.vmem [shape: f32[2,8,32], index: 0, kind: input, shape index: {}]   ;;  %s3627_s1 = inlined_call_operand.hbm [shape: f32[2,8,32], index: 1, kind: input, shape index: {}]   ;;  %s3628_s2 = inlined_call_operand.vmem [shape: f32[2,1,8], index: 2, kind: input, shape index: {}]   ;;  %s3629_s3 = inlined_call_operand.vmem [shape: bf16[2,32,64], index: 3, kind: input, shape index: {}]   ;;  %s3630_s4 = inlined_call_operand.vmem [shape: bf16[2,32,32], index: 4, kind: input, shape index: {}]   ;;  %s3631_s5 = inlined_call_operand.vmem [shape: bf16[2,32,32], index: 5, kind: input, shape index: {}]   ;;  %s3632_s6 = inlined_call_operand.hbm [shape: bf16[2,32,64], index: 6, kind: input, shape index: {}]   ;;  %s3633_s7 = inlined_call_operand.vmem [shape: bf16[2,64,32], index: 7, kind: input, shape index: {}]   ;;  %s3634_s8 = inlined_call_operand.hbm [shape: f32[2,1,64], index: 8, kind: input, shape index: {}]   ;;  %s3635_s9 = inlined_call_operand.hbm [shape: f32[2,1,64], index: 9, kind: input, shape index: {}]   ;;  %s3636_s10 = inlined_call_operand.vmem [shape: f32[2,7,32], index: 10, kind: input, shape index: {}]   ;;  %s3637_s11 = inlined_call_operand.hbm [shape: f32[2,8,32], index: 11, kind: output, shape index: {}]  }
   0x1   :  { %3652 = sst [smem:[#allocation19_spill]] %s3626_s0 }
   0x2   :  { %3653 = sst [smem:[#allocation20_spill]] %s3627_s1 }
   0x3   :  { %3654 = sst [smem:[#allocation21_spill]] %s3628_s2 }
   0x4   :  { %3655 = sst [smem:[#allocation22_spill]] %s3632_s6 }
   0x5   :  { %3656 = sst [smem:[#allocation23_spill]] %s3636_s10 }
   0x6   :  { %3657 = sst [smem:[#allocation24_spill]] %s3637_s11 }
   0x7   :  { %16 = vsyncpa [#allocation3], 0 }
   0x8   :  { %17 = vsyncpa [#allocation6], 0 }
   0x9   :  { %19 = vsyncpa [#allocation6 + $0x1], 0 }
   0xa   :  { %20 = vsyncpa [#allocation9], 0 }
   0xb   :  { %22 = vsyncpa [#allocation9 + $0x1], 0 }
   0xc   :  { %23 = vsyncpa [#allocation4], 0  ;;  %s3054_s17 = smov 0   ;;  %s3056_s18 = smov 0  }
   0xd   :  { %s3058_s19 = smov 0   ;;  %s3060_s20 = smov 0  }
   0xe   :  { %s3062_s21 = smov 0   ;;  %s3064_s22 = smov 0  }
   0xf LB: > { %3658 = sst [smem:[#allocation15_spill]] %s2960_s19  ;;  %s38_s23 = sadd.s32 1, %s2968_s21  ;;  %s2972_s22 = sphi %s3064_s22, %s29_s22   ;;  %s2968_s21 = sphi %s3062_s21, %s3691_s21   ;;  %s2964_s20 = sphi %s3060_s20, %s3690_s20   ;;  %s2960_s19 = sphi %s3058_s19, %s3686_s19   ;;  %s2956_s18 = sphi %s3056_s18, %s3689_s18   ;;  %s2952_s17 = sphi %s3054_s17, %s3688_s17  }
  0x10   : > { %3659 = sst [smem:[#allocation16_spill]] %s2972_s22  ;;  %s204_s24 = sadd.s32 1, %s2960_s19 }
  0x11   : > { %p39_p0 = scmp.ge.s32.totalorder %s38_s23, 2  ;;  %p211_p1 = scmp.ne.s32.totalorder %s2960_s19, %s2956_s18 }
  0x12   : > { %p212_p2 = scmp.eq.s32.totalorder %s2972_s22, 0  ;;  %p2647_p4 = scmp.lt.s32.totalorder %s2972_s22, 2 }
  0x13   : > { %s3693_s23 = smov (%p39_p0, %s38_s23), 0  ;;  %s428_s26 = sand.u32 1, %s2972_s22  }
  0x14   : > { %3660 = sst [smem:[#allocation17_spill]] %s3693_s23  ;;  %p213_p3 = por %p212_p2, %p211_p1 }
  0x15   : > { %s201_s25 = ssub.s32 %s2968_s21, %s3693_s23  ;;  %s3096_s27 = sand.u32 1, %s2960_s19  }
  0x16   : > { %p202_p5 = scmp.eq.s32.totalorder %s201_s25, 0  ;;  %s2403_s28 = sshll.u32 %s2968_s21, 8 }
  0x17   : > { %s2343_s30 = sshll.u32 %s3096_s27, 4  ;;  %s3662_s6 = sld [smem:[#allocation22_spill]] }
  0x18   : > { %s3100_s29 = scalar_select %p202_p5, %s2960_s19, %s204_s24  }
  0x19   : > { %p3108_p6 = pnand %p2647_p4, %p213_p3  ;;  %s432_s16 = scalar_lea.vmem [#allocation5], %s2343_s30 }
  0x1a   : > { %3661 = sst [smem:[#allocation18_spill]] %s3100_s29  ;;  %s439_s25 = sshll.u32 %s432_s16, 4  ;;  %s3112_s25 = int_to_ptr.vmem [resolvable:$true] %s439_s25 }
  0x1b   : > { %s3663_s15 = scalar_select %p3108_p6, 1, 0 }
  0x1c   : > { %s3114_s24 = scalar_lea.sflag [#allocation6], %s428_s26  ;;  %p3120_p8 = pneg %p3108_p6 }
  0x1d   : > { %s3106_s14 = scalar_lea.hbm %s3662_s6, %s2403_s28  ;;  %s2771_s30 = scalar_lea.hbm %s3662_s6, 512 }
  0x1e   : > { %s2766_s23 = scalar_lea.hbm %s3106_s14, 256  ;;  %p2772_p11 = scmp.lt.u32.totalorder %s3106_s14, %s3662_s6 }
  0x1f   : > { %p2767_p7 = scmp.ne.s32.totalorder %s3106_s14, %s2766_s23  ;;  %p2773_p12 = scmp.lt.u32.totalorder %s2771_s30, %s2766_s23 }
  0x20   : > { %s3664_s28 = scalar_select %p3120_p8, 1, 0 }
  0x21   : > { %p2769_p9 = pnand %p3120_p8, %p2767_p7  ;;  %p2774_p13 = por %p2773_p12, %p2772_p11 }
  0x22   : > { %p2775_p0 = scmp.lt.u32.totalorder %s2766_s23, %s3106_s14 }
  0x23   : > { %p2770_p10 = pneg %p2769_p9 }
  0x24   : > { %p2776_p1 = por %p2775_p0, %p2774_p13 }
  0x26   : > { %p2777_p2 = pnand %p2776_p1, %p2770_p10 }
  0x28   : > { %2780 = shalt.err (!%p2777_p2)
}
  0x29   : > { %s2781_s26 = scalar_lea.vmem %s3112_s25, 256  ;;  %s2974_s12 = smov [#allocation5]  }
  0x2a   : > { %p2782_p3 = scmp.ne.s32.totalorder %s3112_s25, %s2781_s26  ;;  %s2786_s13 = sshll.u32 %s2974_s12, 4  ;;  %s2787_s13 = int_to_ptr.vmem [resolvable:$false] %s2786_s13 }
  0x2b   : > { %s2788_s29 = scalar_lea.vmem %s2787_s13, 512  ;;  %p2789_p7 = scmp.lt.s32.totalorder %s3112_s25, %s2787_s13 }
  0x2c   : > { %p2784_p4 = pnand %p2782_p3, %p3120_p8  ;;  %p2790_p9 = scmp.lt.s32.totalorder %s2788_s29, %s2781_s26 }
  0x2e   : > { %p2785_p5 = pneg %p2784_p4  ;;  %p2791_p11 = por %p2790_p9, %p2789_p7 }
  0x30   : > { %p2792_p12 = pnand %p2791_p11, %p2785_p5 }
  0x32   : > { %2795 = shalt.err (!%p2792_p12)
}
  0x33   : > { %s2975_s23 = smov 64   ;;  %s2976_s30 = smov 4  }
  0x34   : > { %2639 = dma.hbm_to_vmem [thread:$0]  (!%p3108_p6), %s3106_s14, 256, %s3112_s25, %s3114_s24, %s2975_s23, %s2975_s23, %s2976_s30  }
  0x35   : > { %s3145_s16 = sadd.s32 4294967295, %s2972_s22   ;;  %p217_p10 = scmp.ne.s32.totalorder %s2956_s18, %s2952_s17 }
  0x36   : > { %p3644_p13 = scmp.eq.s32.totalorder %s3145_s16, 0  ;;  %p2338_p0 = scmp.ge.s32.totalorder %s2972_s22, 1 }
  0x37   : > { %p358_p1 = scmp.lt.s32.totalorder %s2972_s22, 3  ;;  %s2977_s14 = smov [#allocation2]  }
  0x38   : > { %p3154_p2 = por %p3644_p13, %p217_p10  ;;  %s382_s25 = sshll.u32 %s2977_s14, 4  ;;  %s3164_s25 = int_to_ptr.vmem [resolvable:$true] %s382_s25 }
  0x39   : > { %p3158_p3 = pnand %p2338_p0, %p358_p1  ;;  %s3651_s13 = sshll.u32 %s2968_s21, 4 }
  0x3a   : > { %s3665_s26 = scalar_select %p3154_p2, 1, 0 }
  0x3b   : > { %s3666_s12 = scalar_select %p3158_p3, 1, 0 }
  0x3c   : > { %p2632_p4 = pneg %p3158_p3  ;;  %s3178_s30 = scalar_lea.hbm %s3634_s8, %s3651_s13 }
  0x3d   : > { %s460_s6 = scalar_lea.vmem [#allocation7], %s3096_s27  ;;  %s3668_s1 = sld [smem:[#allocation20_spill]] }
  0x3e   : > { %p3168_p5 = pnand %p2632_p4, %p3644_p13  ;;  %s467_s19 = sshll.u32 %s460_s6, 4  ;;  %s3181_s19 = int_to_ptr.vmem [resolvable:$true] %s467_s19 }
  0x40   : > { %p2798_p9 = pneg %p3168_p5 }
  0x43   : > { %s2796_s11 = scalar_lea.hbm %s3668_s1, 256 }
  0x44   : > { %p2797_p7 = scmp.ne.s32.totalorder %s3668_s1, %s2796_s11  ;;  %p2803_p10 = scmp.lt.u32.totalorder %s2796_s11, %s3668_s1 }
  0x46   : > { %p2799_p11 = pnand %p2798_p9, %p2797_p7 }
  0x48   : > { %p2800_p12 = pneg %p2799_p11 }
  0x4a   : > { %p2805_p0 = pnand %p2803_p10, %p2800_p12 }
  0x4c   : > { %2808 = shalt.err (!%p2805_p0)
}
  0x4d   : > { %s2809_s6 = scalar_lea.vmem %s3164_s25, 256  ;;  %p2817_p2 = scmp.lt.s32.totalorder %s3164_s25, %s3164_s25 }
  0x4e   : > { %p2810_p1 = scmp.ne.s32.totalorder %s3164_s25, %s2809_s6  ;;  %p2818_p3 = scmp.lt.s32.totalorder %s2809_s6, %s2809_s6 }
  0x50   : > { %p2812_p4 = pnand %p2810_p1, %p2798_p9  ;;  %p2819_p6 = por %p2818_p3, %p2817_p2 }
  0x52   : > { %p2813_p13 = pneg %p2812_p4 }
  0x54   : > { %p2820_p8 = pnand %p2819_p6, %p2813_p13 }
  0x56   : > { %2823 = shalt.err (!%p2820_p8)
}
  0x57   : > { %s2978_s0 = smov 128   ;;  %s2979_s2 = smov 8  }
  0x58   : > { %2635 = dma.hbm_to_vmem [thread:$0]  (!%p3168_p5), %s3668_s1, 256, %s3164_s25, [#allocation3], %s2978_s0, %s2978_s0, %s2979_s2  }
  0x59   : > { %s2824_s22 = scalar_lea.hbm %s3178_s30, 16  ;;  %p3669_p9 = scmp.ne.s32.totalorder %s3664_s28, 0 }
  0x5a   : > { %p2825_p7 = scmp.ne.s32.totalorder %s3178_s30, %s2824_s22  ;;  %s2829_s29 = scalar_lea.hbm %s3634_s8, 32 }
  0x5b   : > { %p2830_p8 = scmp.lt.u32.totalorder %s3178_s30, %s3634_s8  ;;  %p2831_p13 = scmp.lt.u32.totalorder %s2829_s29, %s2824_s22 }
  0x5c   : > { %p2827_p2 = pnand %p2825_p7, %p3669_p9  ;;  %p2833_p11 = scmp.lt.u32.totalorder %s2824_s22, %s3178_s30 }
  0x5d   : > { %p2832_p3 = por %p2831_p13, %p2830_p8 }
  0x5e   : > { %p2828_p6 = pneg %p2827_p2 }
  0x5f   : > { %p2834_p12 = por %p2833_p11, %p2832_p3 }
  0x61   : > { %p2835_p10 = pnand %p2834_p12, %p2828_p6 }
  0x63   : > { %2838 = shalt.err (!%p2835_p10)
}
  0x64   : > { %s2839_s25 = scalar_lea.vmem %s3181_s19, 16  ;;  %s2980_s17 = smov [#allocation7]  }
  0x65   : > { %p2840_p5 = scmp.ne.s32.totalorder %s3181_s19, %s2839_s25  ;;  %s2844_s0 = sshll.u32 %s2980_s17, 4  ;;  %s2845_s0 = int_to_ptr.vmem [resolvable:$false] %s2844_s0 }
  0x66   : > { %s2846_s13 = scalar_lea.vmem %s2845_s0, 32  ;;  %p2847_p4 = scmp.lt.s32.totalorder %s3181_s19, %s2845_s0 }
  0x67   : > { %p2842_p0 = pnand %p2840_p5, %p3669_p9  ;;  %p2848_p7 = scmp.lt.s32.totalorder %s2846_s13, %s2839_s25 }
  0x69   : > { %p2843_p1 = pneg %p2842_p0  ;;  %p2849_p2 = por %p2848_p7, %p2847_p4 }
  0x6b   : > { %p2850_p8 = pnand %p2849_p2, %p2843_p1 }
  0x6d   : > { %2853 = shalt.err (!%p2850_p8)
}
  0x6e   : > { %p3670_p6 = scmp.ne.s32.totalorder %s3663_s15, 0  ;;  %s3671_s2 = sshll.u32 %s2968_s21, 4 }
  0x6f   : > { %s3231_s22 = scalar_lea.hbm %s3635_s9, %s3671_s2  ;;  %s477_s23 = scalar_lea.vmem [#allocation8], %s3096_s27 }
  0x70   : > { %2642 = dma.hbm_to_vmem [thread:$0]  (!%p3670_p6), %s3178_s30, 16, %s3181_s19, %s3114_s24  }
  0x71   : > { %s484_s14 = sshll.u32 %s477_s23, 4  ;;  %s475_s29 = scalar_lea.sflag [#allocation9], %s3096_s27  ;;  %s485_s14 = int_to_ptr.vmem [resolvable:$true] %s484_s14 }
  0x72   : > { %s2854_s6 = scalar_lea.hbm %s3231_s22, 16  ;;  %s2859_s30 = scalar_lea.hbm %s3635_s9, 32 }
  0x73   : > { %p2855_p13 = scmp.ne.s32.totalorder %s3231_s22, %s2854_s6  ;;  %p2860_p12 = scmp.lt.u32.totalorder %s3231_s22, %s3635_s9 }
  0x74   : > { %p2861_p10 = scmp.lt.u32.totalorder %s2859_s30, %s2854_s6  ;;  %p2863_p0 = scmp.lt.u32.totalorder %s2854_s6, %s3231_s22 }
  0x75   : > { %p2857_p3 = pnand %p2855_p13, %p3669_p9 }
  0x76   : > { %p2862_p5 = por %p2861_p10, %p2860_p12 }
  0x77   : > { %p2858_p11 = pneg %p2857_p3 }
  0x78   : > { %p2864_p1 = por %p2863_p0, %p2862_p5 }
  0x7a   : > { %p2865_p4 = pnand %p2864_p1, %p2858_p11 }
  0x7c   : > { %2868 = shalt.err (!%p2865_p4)
}
  0x7d   : > { %s2869_s27 = scalar_lea.vmem %s485_s14, 16  ;;  %s2981_s0 = smov [#allocation8]  }
  0x7e   : > { %p2870_p7 = scmp.ne.s32.totalorder %s485_s14, %s2869_s27  ;;  %s2874_s13 = sshll.u32 %s2981_s0, 4  ;;  %s2875_s13 = int_to_ptr.vmem [resolvable:$false] %s2874_s13 }
  0x7f   : > { %s2876_s2 = scalar_lea.vmem %s2875_s13, 32  ;;  %p2877_p13 = scmp.lt.s32.totalorder %s485_s14, %s2875_s13 }
  0x80   : > { %p2872_p2 = pnand %p2870_p7, %p3669_p9  ;;  %p2878_p3 = scmp.lt.s32.totalorder %s2876_s2, %s2869_s27 }
  0x82   : > { %p2873_p8 = pneg %p2872_p2  ;;  %p2879_p6 = por %p2878_p3, %p2877_p13 }
  0x84   : > { %p2880_p10 = pnand %p2879_p6, %p2873_p8 }
  0x86   : > { %2883 = shalt.err (!%p2880_p10)
}
  0x87   : > { %p3672_p12 = scmp.ne.s32.totalorder %s3663_s15, 0  ;;  %p3673_p11 = scmp.ne.s32.totalorder %s3666_s12, 0 }
  0x88   : > { %p3674_p5 = scmp.eq.s32.totalorder (!%p3673_p11), %s3145_s16, 0 }
  0x89   : > { %2645 = dma.hbm_to_vmem [thread:$0]  (!%p3672_p12), %s3231_s22, 16, %s485_s14, %s475_s29  }
  0x8a   : > { %500 = sbr.rel (%p3673_p11) target bundleno = 4612 (0x1204), region = 64 }
  0x91   : > { %2935 = dma.done.wait (%p3674_p5), [#allocation3], 256   ;;  %p3675_p9 = pmov %p3674_p5 }
  0x92   : > { %s506_s28 = sand.u32 1, %s3145_s16   ;;  %s3260_s10 = sand.u32 1, %s2956_s18  }
  0x93   : > { %2937 = vsyncadd (%p3675_p9), [#allocation3], 4294967040  ;;  %s2350_s11 = sshll.u32 %s3260_s10, 4  ;;  %s507_s15 = scalar_lea.sflag [#allocation6], %s506_s28 }
  0x94   : > { %s3263_s23 = scalar_lea.vmem [#allocation5], %s2350_s11  ;;  %p3676_p6 = scmp.ne.s32.totalorder %s3665_s26, 0 }
  0x96   : > { %2939 = dma.done.wait (%p3676_p6), %s507_s15, 272  }
  0x97   : > { %2941 = vsyncadd (%p3676_p6), %s507_s15, 4294967024  ;;  %s524_s22 = scalar_lea.sflag [#allocation9], %s3260_s10 }
  0x98   : > { %2943 = dma.done.wait (%p3676_p6), %s524_s22, 16  }
  0x99   : > { %2945 = vsyncadd (%p3676_p6), %s524_s22, 4294967280  ;;  %p613_p0 = scmp.lt.s32.totalorder %s2964_s20, 1  ;;  %s3677_s24 = sld [smem:[#allocation23_spill]] }
  0x9a   : > { %p2360_p1 = scmp.ne.s32.totalorder %s2964_s20, 0 }
  0x9b   : > { %s614_s29 = scalar_select %p613_p0, %s2964_s20, 1 }
  0x9c   : > { %642 = sbr.rel (%p2360_p1) target bundleno = 164 (0xa4), region = 84  ;;  %s3678_s1 = sld [smem:[#allocation19_spill]] (!%p2360_p1)  ;;  %vm645_vm0 = vcmask (!%p2360_p1), 261120  }
  0x9d   : > { %s2404_s6 = sshll.u32 %s614_s29, 4  ;;  %s2407_s19 = sshll.u32 %s614_s29, 5 }
  0x9e   : > { %s617_s25 = scalar_lea.vmem %s3629_s3, %s2404_s6  ;;  %s3284_s0 = scalar_lea.vmem %s3630_s4, %s2404_s6 }
  0x9f   : > { %s3289_s26 = scalar_lea.vmem %s3631_s5, %s2404_s6  ;;  %s3294_s15 = scalar_lea.vmem %s3633_s7, %s2407_s19 }
  0xa0   : > { %s2359_s22 = sshll.u32 %s614_s29, 3 }
  0xa1   : > { %s3299_s30 = scalar_lea.vmem %s3677_s24, %s2359_s22 }
  0xa2   : > { %v643_v0 = vld [vmem:[%s3678_s1] sm:$0xff] (!%p2360_p1)  ;;  %v644_v1 = vld [vmem:[%s3678_s1 + $0x8] sm:$0xff] (!%p2360_p1) }
  0xa3   : > { %646 = vst.msk [vmem:[#allocation10] sm:$0xff] %vm645_vm0, %v643_v0  ;;  %647 = vst.msk [vmem:[#allocation10 + $0x8] sm:$0xff] %vm645_vm0, %v644_v1 }
  0xa4 PF: > { %v2716_v2 = vld [vmem:[%s617_s25] sm:$0xff]   ;;  %v2982_v3 = vmov 0.0   ;;  %v2717_v4 = vld [vmem:[%s617_s25 + $0x8] sm:$0xff]   ;;  %vm2983_vm1 = vmmov 0   ;;  %vm702_vm2 = vcmask 261120   ;;  %s3679_s20 = scalar_lea.vmem [#allocation7], %s3260_s10  ;;  %v748_v28 = vlaneseq }
  0xa5   : > { %2462 = vmatprep.subr.bf16.mxu0 %v2982_v3  ;;  %2470 = vmatprep.subr.bf16.mxu1 %v2982_v3  ;;  %v679_v7 = vld [vmem:[#allocation2] sm:$0xff]  ;;  %v680_v8 = vld [vmem:[#allocation2 + $0x8] sm:$0xff]  ;;  %s2984_s12 = smov 96   ;;  %vm827_vm3 = vcmask 64512   ;;  %vm950_vm4 = vcmask 1043456   ;;  %s3680_s19 = sld [smem:[#allocation21_spill]] }
  0xa6   : > { %2463 = vmatpush3.bf16.msra.mxu0 %v2716_v2  ;;  %2466 = vmatprep.mubr.msk.bf16.mxu0 %vm2983_vm1, %v2982_v3  ;;  %v2718_v12 = vld [vmem:[%s3284_s0] sm:$0xff]   ;;  %v2719_v13 = vld [vmem:[%s3284_s0 + $0x8] sm:$0xff]   ;;  %v3354_v29 = vshrl.u32 %v748_v28, 7  ;;  %s2985_s28 = smov 88   ;;  %s2986_s11 = smov 120   ;;  %vm2039_vm5 = vcmask 523264  }
  0xa7   : > { %2464 = vmatprep.subr.bf16.mxu0 %v2982_v3  ;;  %2474 = vmatprep.mubr.msk.bf16.mxu1 %vm2983_vm1, %v2982_v3  ;;  %v2361_v15 = vld [vmem:[%s3679_s20] ss:$0 sm:$0xff]  ;;  %s2987_s22 = smov 80   ;;  %s2988_s24 = smov 112  }
  0xa8   : > { %2471 = vmatpush3.bf16.msra.mxu1 %v2718_v12  ;;  %v750_v30 = vsub.s32 0, %v3354_v29  ;;  %v3358_v31 = vld [vmem:[%s3299_s30] sm:$0x7f]  ;;  %s2989_s30 = smov 72   ;;  %s2990_s17 = smov 104  }
  0xa9   : > { %2472 = vmatprep.subr.bf16.mxu1 %v2982_v3  ;;  %p2649_p4 = scmp.eq.s32.totalorder %s3145_s16, 1 }
  0xaa   : > { %v3312_v5 = vld [vmem:[#allocation10] sm:$0xff]  ;;  %v3314_v6 = vld [vmem:[#allocation10 + $0x8] sm:$0xff]  ;;  %2465 = vmatpush3.bf16.msra.mxu0 %v2717_v4  ;;  %v751_v32 = vrot.slane %v3358_v31, %v750_v30 }
  0xab   : > { %v681_v9 = vadd.f32 %v679_v7, %v3312_v5  ;;  %v682_v10 = vadd.f32 %v680_v8, %v3314_v6  ;;  %2478 = vmatprep.subr.bf16.mxu0 %v2982_v3  ;;  %v747_v14 = vpack.c.bf16 %v3314_v6, %v3312_v5  ;;  %s3681_s25 = smov %s3680_s19  ;;  %v3374_v43 = vld [vmem:[%s3680_s19] ss:$0 sm:$0xff] }
  0xac   : > { %2473 = vmatpush3.bf16.msra.mxu1 %v2719_v13  ;;  %v3380_v48 = vld [vmem:[%s3681_s25 + $0x1] ss:$0 sm:$0xff] }
  0xad   : > { %v683_v11 = vpack.c.bf16 %v682_v10, %v681_v9  ;;  %2484 = vmatprep.subr.bf16.mxu1 %v2982_v3 }
  0xaf   : > { %2467 = vmatmul.mubr.msk.bf16.vlgmr.msra.gmra.mrb[0].mxu0 %vm702_vm2, %v683_v11  ;;  %2475 = vmatmul.mubr.msk.bf16.vlgmr.msra.gmra.mrb[0].mxu1 %vm702_vm2, %v747_v14 }
  0xb0   : > { %2480 = vmatprep.mubr.msk.bf16.mxu0 %vm2983_vm1, %v2982_v3  ;;  %2486 = vmatprep.mubr.msk.bf16.mxu1 %vm2983_vm1, %v2982_v3 }
 0x182   : > { %v740_v16 = vpop.f32.mrb[0].mxu0  ;;  %v801_v33 = vpop.f32.mrb[0].mxu1 }
 0x183   : > { %v741_v17 = vadd.f32 %v2361_v15, %v740_v16  ;;  %v2468_v18 = vpop.f32.mrb[1].mxu0  ;;  %v802_v34 = vadd.f32 %v801_v33, %v751_v32  ;;  %v2476_v35 = vpop.f32.mrb[1].mxu1 }
 0x184   : > { %v743_v19 = vpop.f32.mrb[2].mxu0  ;;  %v804_v36 = vpop.f32.mrb[2].mxu1 }
 0x185   : > { %v3336_v20 = vpack.c.bf16 %v741_v17, %v741_v17  ;;  %v744_v21 = vadd.f32 %v2361_v15, %v743_v19  ;;  %v2469_v22 = vpop.f32.mrb[3].mxu0  ;;  %v805_v37 = vadd.f32 %v804_v36, %v751_v32  ;;  %v2477_v38 = vpop.f32.mrb[3].mxu1  ;;  %v3361_v39 = vpack.c.bf16 %v802_v34, %v802_v34 }
 0x187   : > { %825 = vrot.lane.b32.xlu0 %v3336_v20, %s2984_s12  ;;  %v3339_v23 = vpack.c.bf16 %v744_v21, %v744_v21  ;;  %v3363_v40 = vpack.c.bf16 %v805_v37, %v805_v37  ;;  %v952_v41 = vsel %vm950_vm4, %v3361_v39, 0 }
 0x189   : > { %v998_v42 = vsel %vm950_vm4, %v3363_v40, 0 }
 0x18b   : > { %875 = vrot.lane.b32.xlu0 %v3339_v23, %s2984_s12 }
 0x1f9   : > { %v826_v24 = vpop.permute.xlu0 %825 }
 0x1fa   : > { %v832_v25 = vsel %vm827_vm3, %v826_v24, 0 }
 0x1fb   : > { %2479 = vmatpush3.bf16.xpose.msra.mxu0 %v832_v25 }
 0x1fc   : > { %2490 = vmatprep.subr.bf16.mxu0 %v2982_v3 }
 0x1fd   : > { %v876_v26 = vpop.permute.xlu0 %875 }
 0x1fe   : > { %v881_v27 = vsel %vm827_vm3, %v876_v26, 0 }
 0x1ff   : > { %2485 = vmatpush3.bf16.xpose.msra.mxu1 %v881_v27 }
 0x200   : > { %2496 = vmatprep.subr.bf16.mxu1 %v2982_v3 }
 0x202   : > { %2481 = vmatmul.mubr.msk.bf16.vlgmr.msra.gmra.mrb[4].mxu0 %vm827_vm3, %v3336_v20 }
 0x203   : > { %2492 = vmatprep.mubr.msk.bf16.mxu0 %vm2983_vm1, %v2982_v3  ;;  %2491 = vmatpush3.bf16.msra.mxu0 %v952_v41 }
 0x204   : > { %2502 = vmatprep.subr.bf16.mxu0 %v2982_v3 }
 0x206   : > { %2487 = vmatmul.mubr.msk.bf16.vlgmr.msra.gmra.mrb[4].mxu1 %vm827_vm3, %v3339_v23 }
 0x207   : > { %2498 = vmatprep.mubr.msk.bf16.mxu1 %vm2983_vm1, %v2982_v3  ;;  %2497 = vmatpush3.bf16.msra.mxu1 %v998_v42 }
 0x208   : > { %2508 = vmatprep.subr.bf16.mxu1 %v2982_v3 }
 0x2d5   : > { %v868_v44 = vpop.f32.mrb[4].mxu0 }
 0x2d6   : > { %v869_v45 = vadd.f32 %v3374_v43, %v868_v44  ;;  %v2482_v46 = vpop.f32.mrb[5].mxu0 }
 0x2d7   : > { %v871_v47 = vpop.f32.mrb[6].mxu0 }
 0x2d8   : > { %v2483_v49 = vpop.f32.mrb[7].mxu0  ;;  %v923_v50 = vsel %vm827_vm3, %v869_v45, -inf }
 0x2d9   : > { %v917_v51 = vpop.f32.mrb[4].mxu1  ;;  %924 = vmax.xlane.f32.xlu1 %v923_v50 }
 0x2da   : > { %v918_v52 = vadd.f32 %v3380_v48, %v917_v51  ;;  %v2488_v53 = vpop.f32.mrb[5].mxu1 }
 0x2db   : > { %v920_v54 = vpop.f32.mrb[6].mxu1 }
 0x2dc   : > { %v2489_v55 = vpop.f32.mrb[7].mxu1  ;;  %v926_v56 = vsel %vm827_vm3, %v918_v52, -inf }
 0x2dd   : > { %927 = vmax.xlane.f32.xlu1 %v926_v56 }
 0x2ee   : > { %1043 = vrot.lane.b32.xlu1 %v3336_v20, %s2985_s28 }
 0x2f2   : > { %1093 = vrot.lane.b32.xlu1 %v3339_v23, %s2985_s28 }
 0x366   : > { %v925_v57 = vpop.xlane.xlu1 %924 }
 0x367   : > { %v929_v58 = vsub.f32 %v869_v45, %v925_v57 }
 0x369   : > { %v931_v59 = vmul.f32 1.442695, %v929_v58 }
 0x36a   : > { %v928_v60 = vpop.xlane.xlu1 %927 }
 0x36b   : > { %2726 = vpow2.f32 %v931_v59  ;;  %v930_v61 = vsub.f32 %v918_v52, %v928_v60 }
 0x36d   : > { %v933_v62 = vmul.f32 1.442695, %v930_v61 }
 0x36e   : > { %v1044_v4 = vpop.permute.xlu1 %1043 }
 0x36f   : > { %2728 = vpow2.f32 %v933_v62  ;;  %v1049_v14 = vsel %vm827_vm3, %v1044_v4, 0 }
 0x372   : > { %v1094_v7 = vpop.permute.xlu1 %1093 }
 0x373   : > { %v1099_v17 = vsel %vm827_vm3, %v1094_v7, 0 }
 0x375   : > { %v2727_v63 = vpop.eup %2726 }
 0x376   : > { %v935_v0 = vsel %vm827_vm3, %v2727_v63, 0.0 }
 0x377   : > { %936 = vadd.xlane.f32.xlu0 %v935_v0 }
 0x379   : > { %v2729_v1 = vpop.eup %2728 }
 0x37a   : > { %v938_v2 = vsel %vm827_vm3, %v2729_v1, 0.0 }
 0x37b   : > { %939 = vadd.xlane.f32.xlu1 %v938_v2  ;;  %v661_v2 = vld [vmem:[%s3289_s26 + $0x4] sm:$0xf] }
 0x38c   : > { %1041 = vrot.lane.b32.xlu1 %v3336_v20, %s2986_s11 }
 0x390   : > { %1091 = vrot.lane.b32.xlu1 %v3339_v23, %s2986_s11 }
 0x404   : > { %v937_v8 = vpop.xlane.xlu0 %936 }
 0x405   : > { %2730 = vrcp.f32 %v937_v8  ;;  %v1268_v8 = vsel %vm950_vm4, %v661_v2, 0 }
 0x408   : > { %v940_v9 = vpop.xlane.xlu1 %939 }
 0x409   : > { %2732 = vrcp.f32 %v940_v9 }
 0x40c   : > { %v1042_v18 = vpop.permute.xlu1 %1041 }
 0x40f   : > { %v2731_v10 = vpop.eup %2730 }
 0x410   : > { %v943_v11 = vmul.f32 %v2731_v10, %v2727_v63  ;;  %v1092_v19 = vpop.permute.xlu1 %1091  ;;  %v660_v10 = vld [vmem:[%s3289_s26] sm:$0xf] }
 0x412   : > { %v945_v12 = vpack.c.bf16 %v943_v11, %v943_v11 }
 0x413   : > { %v2733_v13 = vpop.eup %2732 }
 0x414   : > { %v944_v15 = vmul.f32 %v2733_v13, %v2729_v1  ;;  %2493 = vmatmul.mubr.msk.bf16.vlgmr.msra.gmra.mrb[8].mxu0 %vm827_vm3, %v945_v12  ;;  %v1315_v13 = vsel %vm950_vm4, %v660_v10, 0 }
 0x415   : > { %2503 = vmatpush3.bf16.xpose.msra.mxu0 %v1049_v14  ;;  %2504 = vmatprep.mubr.msk.bf16.mxu0 %vm2983_vm1, %v2982_v3 }
 0x416   : > { %v946_v16 = vpack.c.bf16 %v944_v15, %v944_v15  ;;  %2514 = vmatprep.subr.bf16.mxu0 %v2982_v3 }
 0x418   : > { %2499 = vmatmul.mubr.msk.bf16.vlgmr.msra.gmra.mrb[8].mxu1 %vm827_vm3, %v946_v16 }
 0x419   : > { %2509 = vmatpush3.bf16.xpose.msra.mxu1 %v1099_v17  ;;  %2510 = vmatprep.mubr.msk.bf16.mxu1 %vm2983_vm1, %v2982_v3 }
 0x41a   : > { %2520 = vmatprep.subr.bf16.mxu1 %v2982_v3 }
 0x41c   : > { %2505 = vmatmul.mubr.msk.bf16.vlgmr.msra.gmra.mrb[12].mxu0 %vm827_vm3, %v1042_v18 }
 0x41d   : > { %2516 = vmatprep.mubr.msk.bf16.mxu0 %vm2983_vm1, %v2982_v3 }
 0x420   : > { %2511 = vmatmul.mubr.msk.bf16.vlgmr.msra.gmra.mrb[12].mxu1 %vm827_vm3, %v1092_v19 }
 0x421   : > { %2522 = vmatprep.mubr.msk.bf16.mxu1 %vm2983_vm1, %v2982_v3 }
 0x4e7   : > { %v3409_v21 = vpop.f32.mrb[8].mxu0 }
 0x4e8   : > { %v2494_v22 = vpop.f32.mrb[9].mxu0 }
 0x4e9   : > { %v991_v24 = vpop.f32.mrb[10].mxu0 }
 0x4ea   : > { %v2495_v25 = vpop.f32.mrb[11].mxu0 }
 0x4eb   : > { %v3411_v26 = vpop.f32.mrb[8].mxu1 }
 0x4ec   : > { %v1040_v27 = vpack.c.bf16 %v3411_v26, %v3409_v21  ;;  %v2500_v28 = vpop.f32.mrb[9].mxu1 }
 0x4ed   : > { %v1037_v30 = vpop.f32.mrb[10].mxu1 }
 0x4ee   : > { %v2501_v32 = vpop.f32.mrb[11].mxu1 }
 0x4ef   : > { %v1085_v33 = vpop.f32.mrb[12].mxu0 }
 0x4f0   : > { %v1086_v34 = vadd.f32 %v3374_v43, %v1085_v33  ;;  %v2506_v35 = vpop.f32.mrb[13].mxu0 }
 0x4f1   : > { %v1088_v36 = vpop.f32.mrb[14].mxu0 }
 0x4f2   : > { %v2507_v37 = vpop.f32.mrb[15].mxu0  ;;  %v1141_v38 = vsel %vm827_vm3, %v1086_v34, -inf }
 0x4f3   : > { %v1135_v41 = vpop.f32.mrb[12].mxu1  ;;  %1142 = vmax.xlane.f32.xlu0 %v1141_v38 }
 0x4f4   : > { %v1136_v42 = vadd.f32 %v3380_v48, %v1135_v41  ;;  %v2512_v44 = vpop.f32.mrb[13].mxu1 }
 0x4f5   : > { %v1138_v45 = vpop.f32.mrb[14].mxu1 }
 0x4f6   : > { %v2513_v46 = vpop.f32.mrb[15].mxu1  ;;  %v1144_v47 = vsel %vm827_vm3, %v1136_v42, -inf }
 0x4f7   : > { %1145 = vmax.xlane.f32.xlu1 %v1144_v47 }
 0x508   : > { %1410 = vrot.lane.b32.xlu1 %v3339_v23, %s2987_s22 }
 0x509   : > { %1166 = vrot.lane.b32.xlu0 %v3361_v39, %s2986_s11 }
 0x580   : > { %v1143_v49 = vpop.xlane.xlu0 %1142 }
 0x581   : > { %v1147_v50 = vsub.f32 %v1086_v34, %v1143_v49 }
 0x583   : > { %v1149_v51 = vmul.f32 1.442695, %v1147_v50 }
 0x584   : > { %v1146_v52 = vpop.xlane.xlu1 %1145  ;;  %v1167_v53 = vpop.permute.xlu0 %1166 }
 0x585   : > { %2734 = vpow2.f32 %v1149_v51  ;;  %v1148_v54 = vsub.f32 %v1136_v42, %v1146_v52  ;;  %v1172_v55 = vsel %vm950_vm4, %v1167_v53, 0 }
 0x586   : > { %2515 = vmatpush3.bf16.msra.mxu0 %v1172_v55 }
 0x587   : > { %v1151_v56 = vmul.f32 1.442695, %v1148_v54  ;;  %2526 = vmatprep.subr.bf16.mxu0 %v2982_v3 }
 0x588   : > { %v1411_v15 = vpop.permute.xlu1 %1410 }
 0x589   : > { %2736 = vpow2.f32 %v1151_v56  ;;  %v1416_v16 = vsel %vm827_vm3, %v1411_v15, 0 }
 0x58f   : > { %v2735_v57 = vpop.eup %2734 }
 0x590   : > { %v1153_v58 = vsel %vm827_vm3, %v2735_v57, 0.0 }
 0x591   : > { %1154 = vadd.xlane.f32.xlu0 %v1153_v58 }
 0x593   : > { %v2737_v59 = vpop.eup %2736 }
 0x594   : > { %v1156_v60 = vsel %vm827_vm3, %v2737_v59, 0.0 }
 0x595   : > { %1157 = vadd.xlane.f32.xlu0 %v1156_v60 }
 0x5ab   : > { %1215 = vrot.lane.b32.xlu0 %v3363_v40, %s2986_s11 }
 0x5af   : > { %1360 = vrot.lane.b32.xlu0 %v3336_v20, %s2987_s22 }
 0x5b3   : > { %1358 = vrot.lane.b32.xlu0 %v3336_v20, %s2988_s24 }
 0x5b7   : > { %1408 = vrot.lane.b32.xlu0 %v3339_v23, %s2988_s24 }
 0x61e   : > { %v1155_v61 = vpop.xlane.xlu0 %1154 }
 0x61f   : > { %2738 = vrcp.f32 %v1155_v61 }
 0x622   : > { %v1158_v62 = vpop.xlane.xlu0 %1157 }
 0x623   : > { %2740 = vrcp.f32 %v1158_v62 }
 0x626   : > { %v1216_v63 = vpop.permute.xlu0 %1215 }
 0x627   : > { %v1221_v0 = vsel %vm950_vm4, %v1216_v63, 0 }
 0x628   : > { %2521 = vmatpush3.bf16.msra.mxu1 %v1221_v0 }
 0x629   : > { %v2739_v1 = vpop.eup %2738  ;;  %2532 = vmatprep.subr.bf16.mxu1 %v2982_v3 }
 0x62a   : > { %v1161_v4 = vmul.f32 %v2739_v1, %v2735_v57  ;;  %v1361_v14 = vpop.permute.xlu0 %1360 }
 0x62b   : > { %v1366_v30 = vsel %vm827_vm3, %v1361_v14, 0 }
 0x62c   : > { %v1163_v7 = vpack.c.bf16 %v1161_v4, %v1161_v4 }
 0x62d   : > { %v2741_v9 = vpop.eup %2740 }
 0x62e   : > { %v1162_v11 = vmul.f32 %v2741_v9, %v2737_v59  ;;  %2517 = vmatmul.mubr.msk.bf16.vlgmr.msra.gmra.mrb[16].mxu0 %vm827_vm3, %v1163_v7  ;;  %v1359_v17 = vpop.permute.xlu0 %1358 }
 0x62f   : > { %2527 = vmatpush3.bf16.msra.mxu0 %v1268_v8  ;;  %2528 = vmatprep.mubr.msk.bf16.mxu0 %vm2983_vm1, %v2982_v3 }
 0x630   : > { %v1164_v12 = vpack.c.bf16 %v1162_v11, %v1162_v11  ;;  %2538 = vmatprep.subr.bf16.mxu0 %v2982_v3 }
 0x632   : > { %2523 = vmatmul.mubr.msk.bf16.vlgmr.msra.gmra.mrb[16].mxu1 %vm827_vm3, %v1164_v12  ;;  %v1409_v18 = vpop.permute.xlu0 %1408 }
 0x633   : > { %2533 = vmatpush3.bf16.msra.mxu1 %v1315_v13  ;;  %2534 = vmatprep.mubr.msk.bf16.mxu1 %vm2983_vm1, %v2982_v3 }
 0x634   : > { %2544 = vmatprep.subr.bf16.mxu1 %v2982_v3 }
 0x63a   : > { %2535 = vmatmul.mubr.msk.bf16.vlgmr.msra.gmra.mrb[20].mxu1 %vm827_vm3, %v1040_v27 }
 0x63b   : > { %2546 = vmatprep.mubr.msk.bf16.mxu1 %vm2983_vm1, %v2982_v3 }
 0x63c   : > { %2545 = vmatpush3.bf16.xpose.msra.mxu1 %v1416_v16 }
 0x63d   : > { %2556 = vmatprep.subr.bf16.mxu1 %v2982_v3 }
 0x643   : > { %2547 = vmatmul.mubr.msk.bf16.vlgmr.msra.gmra.mrb[24].mxu1 %vm827_vm3, %v1409_v18 }
 0x644   : > { %2558 = vmatprep.mubr.msk.bf16.mxu1 %vm2983_vm1, %v2982_v3 }
 0x701   : > { %v1208_v19 = vpop.f32.mrb[16].mxu0 }
 0x702   : > { %v2518_v22 = vpop.f32.mrb[17].mxu0 }
 0x703   : > { %v1211_v21 = vpop.f32.mrb[18].mxu0  ;;  %v662_v22 = vld [vmem:[%s3289_s26 + $0x8] sm:$0xf] }
 0x704   : > { %v2519_v24 = vpop.f32.mrb[19].mxu0 }
 0x705   : > { %v1257_v25 = vpop.f32.mrb[16].mxu1 }
 0x706   : > { %v1263_v26 = vpack.c.bf16 %v1257_v25, %v1208_v19  ;;  %v2524_v27 = vpop.f32.mrb[17].mxu1  ;;  %v1583_v25 = vsel %vm950_vm4, %v662_v22, 0 }
 0x707   : > { %v1260_v28 = vpop.f32.mrb[18].mxu1 }
 0x708   : > { %v2525_v32 = vpop.f32.mrb[19].mxu1  ;;  %2529 = vmatmul.mubr.msk.bf16.vlgmr.msra.gmra.mrb[20].mxu0 %vm827_vm3, %v1263_v26 }
 0x709   : > { %2539 = vmatpush3.bf16.xpose.msra.mxu0 %v1366_v30  ;;  %2540 = vmatprep.mubr.msk.bf16.mxu0 %vm2983_vm1, %v2982_v3 }
 0x70a   : > { %2550 = vmatprep.subr.bf16.mxu0 %v2982_v3 }
 0x70d   : > { %v1351_v33 = vpop.f32.mrb[20].mxu1 }
 0x70e   : > { %v2536_v34 = vpop.f32.mrb[21].mxu1 }
 0x70f   : > { %v1354_v35 = vpop.f32.mrb[22].mxu1 }
 0x710   : > { %v2537_v36 = vpop.f32.mrb[23].mxu1  ;;  %2541 = vmatmul.mubr.msk.bf16.vlgmr.msra.gmra.mrb[24].mxu0 %vm827_vm3, %v1359_v17 }
 0x711   : > { %2552 = vmatprep.mubr.msk.bf16.mxu0 %vm2983_vm1, %v2982_v3 }
 0x716   : > { %v1452_v37 = vpop.f32.mrb[24].mxu1 }
 0x717   : > { %v1453_v38 = vadd.f32 %v3380_v48, %v1452_v37  ;;  %v2548_v41 = vpop.f32.mrb[25].mxu1 }
 0x718   : > { %v1455_v42 = vpop.f32.mrb[26].mxu1 }
 0x719   : > { %v2549_v44 = vpop.f32.mrb[27].mxu1  ;;  %v1461_v45 = vsel %vm827_vm3, %v1453_v38, -inf }
 0x71a   : > { %1462 = vmax.xlane.f32.xlu1 %v1461_v45 }
 0x72b   : > { %1530 = vrot.lane.b32.xlu1 %v3363_v40, %s2988_s24 }
 0x72f   : > { %1630 = vrot.lane.b32.xlu1 %v3336_v20, %s2989_s30 }
 0x733   : > { %1628 = vrot.lane.b32.xlu1 %v3336_v20, %s2990_s17 }
 0x7a7   : > { %v1463_v46 = vpop.xlane.xlu1 %1462 }
 0x7a8   : > { %v1465_v50 = vsub.f32 %v1453_v38, %v1463_v46 }
 0x7aa   : > { %v1468_v51 = vmul.f32 1.442695, %v1465_v50 }
 0x7ab   : > { %v1531_v47 = vpop.permute.xlu1 %1530 }
 0x7ac   : > { %v1536_v49 = vsel %vm950_vm4, %v1531_v47, 0  ;;  %2742 = vpow2.f32 %v1468_v51 }
 0x7ad   : > { %2557 = vmatpush3.bf16.msra.mxu1 %v1536_v49 }
 0x7ae   : > { %2568 = vmatprep.subr.bf16.mxu1 %v2982_v3 }
 0x7af   : > { %v1631_v12 = vpop.permute.xlu1 %1630 }
 0x7b0   : > { %v1636_v14 = vsel %vm827_vm3, %v1631_v12, 0  ;;  %v663_v12 = vld [vmem:[%s3289_s26 + $0xc] sm:$0xf] }
 0x7b3   : > { %v1629_v15 = vpop.permute.xlu1 %1628 }
 0x7b6   : > { %v2743_v63 = vpop.eup %2742 }
 0x7b7   : > { %v1473_v0 = vsel %vm827_vm3, %v2743_v63, 0.0 }
 0x7db   : > { %v1304_v52 = vpop.f32.mrb[20].mxu0 }
 0x7dc   : > { %v3476_v53 = vadd.f32 %v1351_v33, %v1304_v52  ;;  %v2530_v54 = vpop.f32.mrb[21].mxu0 }
 0x7dd   : > { %v1307_v55 = vpop.f32.mrb[22].mxu0 }
 0x7de   : > { %v3478_v56 = vadd.f32 %v1354_v35, %v1307_v55  ;;  %v2531_v57 = vpop.f32.mrb[23].mxu0 }
 0x7e3   : > { %v1402_v58 = vpop.f32.mrb[24].mxu0 }
 0x7e4   : > { %v1403_v20 = vadd.f32 %v3374_v43, %v1402_v58  ;;  %v2542_v59 = vpop.f32.mrb[25].mxu0 }
 0x7e5   : > { %v1405_v60 = vpop.f32.mrb[26].mxu0 }
 0x7e6   : > { %v2543_v61 = vpop.f32.mrb[27].mxu0  ;;  %v1458_v62 = vsel %vm827_vm3, %v1403_v20, -inf }
 0x7e7   : > { %1459 = vmax.xlane.f32.xlu0 %v1458_v62 }
 0x7eb   : > { %1474 = vadd.xlane.f32.xlu0 %v1473_v0 }
 0x874   : > { %v1460_v1 = vpop.xlane.xlu0 %1459 }
 0x875   : > { %v1464_v2 = vsub.f32 %v1403_v20, %v1460_v1 }
 0x877   : > { %v1466_v4 = vmul.f32 1.442695, %v1464_v2 }
 0x878   : > { %v1475_v7 = vpop.xlane.xlu0 %1474 }
 0x879   : > { %2744 = vpow2.f32 %v1466_v4 }
 0x87a   : > { %2746 = vrcp.f32 %v1475_v7 }
 0x883   : > { %v2745_v8 = vpop.eup %2744 }
 0x884   : > { %v2747_v9 = vpop.eup %2746  ;;  %v1470_v10 = vsel %vm827_vm3, %v2745_v8, 0.0 }
 0x885   : > { %v1479_v11 = vmul.f32 %v2747_v9, %v2743_v63  ;;  %1471 = vadd.xlane.f32.xlu0 %v1470_v10 }
 0x887   : > { %v1481_v13 = vpack.c.bf16 %v1479_v11, %v1479_v11 }
 0x889   : > { %2559 = vmatmul.mubr.msk.bf16.vlgmr.msra.gmra.mrb[28].mxu1 %vm827_vm3, %v1481_v13  ;;  %v1853_v13 = vsel %vm950_vm4, %v663_v12, 0 }
 0x88a   : > { %2569 = vmatpush3.bf16.xpose.msra.mxu1 %v1636_v14  ;;  %2570 = vmatprep.mubr.msk.bf16.mxu1 %vm2983_vm1, %v2982_v3 }
 0x88b   : > { %2580 = vmatprep.subr.bf16.mxu1 %v2982_v3 }
 0x891   : > { %2571 = vmatmul.mubr.msk.bf16.vlgmr.msra.gmra.mrb[32].mxu1 %vm827_vm3, %v1629_v15 }
 0x892   : > { %2582 = vmatprep.mubr.msk.bf16.mxu1 %vm2983_vm1, %v2982_v3 }
 0x89b   : > { %1482 = vrot.lane.b32.xlu0 %v3361_v39, %s2988_s24 }
 0x89f   : > { %1680 = vrot.lane.b32.xlu0 %v3339_v23, %s2989_s30 }
 0x8a3   : > { %1678 = vrot.lane.b32.xlu0 %v3339_v23, %s2990_s17 }
 0x912   : > { %v1472_v16 = vpop.xlane.xlu0 %1471 }
 0x913   : > { %2748 = vrcp.f32 %v1472_v16 }
 0x916   : > { %v1483_v17 = vpop.permute.xlu0 %1482 }
 0x917   : > { %v1488_v18 = vsel %vm950_vm4, %v1483_v17, 0 }
 0x918   : > { %2551 = vmatpush3.bf16.msra.mxu0 %v1488_v18 }
 0x919   : > { %2562 = vmatprep.subr.bf16.mxu0 %v2982_v3 }
 0x91a   : > { %v1681_v37 = vpop.permute.xlu0 %1680 }
 0x91b   : > { %v1686_v45 = vsel %vm827_vm3, %v1681_v37, 0 }
 0x91d   : > { %v2749_v19 = vpop.eup %2748 }
 0x91e   : > { %v1478_v21 = vmul.f32 %v2749_v19, %v2745_v8 }
 0x920   : > { %v1480_v24 = vpack.c.bf16 %v1478_v21, %v1478_v21 }
 0x922   : > { %2553 = vmatmul.mubr.msk.bf16.vlgmr.msra.gmra.mrb[28].mxu0 %vm827_vm3, %v1480_v24 }
 0x923   : > { %2563 = vmatpush3.bf16.msra.mxu0 %v1583_v25  ;;  %2564 = vmatprep.mubr.msk.bf16.mxu0 %vm2983_vm1, %v2982_v3 }
 0x924   : > { %2574 = vmatprep.subr.bf16.mxu0 %v2982_v3 }
 0x95c   : > { %v1572_v23 = vpop.f32.mrb[28].mxu1 }
 0x95d   : > { %v2560_v26 = vpop.f32.mrb[29].mxu1 }
 0x95e   : > { %v1575_v27 = vpop.f32.mrb[30].mxu1 }
 0x95f   : > { %v2561_v28 = vpop.f32.mrb[31].mxu1 }
 0x964   : > { %v1672_v30 = vpop.f32.mrb[32].mxu1 }
 0x965   : > { %v1673_v32 = vadd.f32 %v3374_v43, %v1672_v30  ;;  %v2572_v33 = vpop.f32.mrb[33].mxu1  ;;  %v1679_v43 = vpop.permute.xlu0 %1678  ;;  %v1900_v30 = vsub.s32 1, %v3354_v29 }
 0x966   : > { %v1675_v34 = vpop.f32.mrb[34].mxu1 }
 0x967   : > { %v2573_v35 = vpop.f32.mrb[35].mxu1  ;;  %v1728_v36 = vsel %vm827_vm3, %v1673_v32, -inf }
 0x968   : > { %1729 = vmax.xlane.f32.xlu1 %v1728_v36 }
 0x9f5   : > { %v1524_v38 = vpop.f32.mrb[28].mxu0  ;;  %v1730_v47 = vpop.xlane.xlu1 %1729 }
 0x9f6   : > { %v1578_v41 = vpack.c.bf16 %v1572_v23, %v1524_v38  ;;  %v2554_v42 = vpop.f32.mrb[29].mxu0  ;;  %v1734_v49 = vsub.f32 %v1673_v32, %v1730_v47  ;;  %v1901_v32 = vrot.slane %v3358_v31, %v1900_v30 }
 0x9f7   : > { %v1527_v44 = vpop.f32.mrb[30].mxu0 }
 0x9f8   : > { %v2555_v46 = vpop.f32.mrb[31].mxu0  ;;  %2565 = vmatmul.mubr.msk.bf16.vlgmr.msra.gmra.mrb[32].mxu0 %vm827_vm3, %v1578_v41  ;;  %v1736_v50 = vmul.f32 1.442695, %v1734_v49 }
 0x9f9   : > { %2575 = vmatpush3.bf16.xpose.msra.mxu0 %v1686_v45  ;;  %2576 = vmatprep.mubr.msk.bf16.mxu0 %vm2983_vm1, %v2982_v3 }
 0x9fa   : > { %2586 = vmatprep.subr.bf16.mxu0 %v2982_v3  ;;  %2750 = vpow2.f32 %v1736_v50 }
 0xa00   : > { %2577 = vmatmul.mubr.msk.bf16.vlgmr.msra.gmra.mrb[36].mxu0 %vm827_vm3, %v1679_v43 }
 0xa01   : > { %2588 = vmatprep.mubr.msk.bf16.mxu0 %vm2983_vm1, %v2982_v3 }
 0xa04   : > { %v2751_v0 = vpop.eup %2750 }
 0xacb   : > { %v1619_v51 = vpop.f32.mrb[32].mxu0 }
 0xacc   : > { %v3517_v52 = vadd.f32 %v1619_v51, %v3476_v53  ;;  %v2566_v54 = vpop.f32.mrb[33].mxu0  ;;  %v1740_v53 = vsel %vm827_vm3, %v2751_v0, 0.0 }
 0xacd   : > { %v1622_v55 = vpop.f32.mrb[34].mxu0 }
 0xace   : > { %v3520_v57 = vadd.f32 %v1622_v55, %v3478_v56  ;;  %v2567_v58 = vpop.f32.mrb[35].mxu0 }
 0xacf   : > { %v2720_v58 = vld [vmem:[%s3263_s23] sm:$0xff]  }
 0xad3   : > { %v1722_v20 = vpop.f32.mrb[36].mxu0 }
 0xad4   : > { %v1723_v59 = vadd.f32 %v3380_v48, %v1722_v20  ;;  %v2578_v60 = vpop.f32.mrb[37].mxu0  ;;  %v2721_v20 = vld [vmem:[%s3263_s23 + $0x8] sm:$0xff]   ;;  %s3682_s23 = scalar_lea.vmem [#allocation8], %s3260_s10  ;;  %s2991_s10 = smov [#allocation10]  }
 0xad5   : > { %v1725_v61 = vpop.f32.mrb[38].mxu0  ;;  %v2723_v60 = vld [vmem:[%s3294_s15 + $0x8] sm:$0xff]   ;;  %s2135_s26 = sshll.u32 %s2991_s10, 4  ;;  %s2136_s26 = int_to_ptr.vmem [resolvable:$true] %s2135_s26 }
 0xad6   : > { %v2579_v62 = vpop.f32.mrb[39].mxu0  ;;  %v1731_v63 = vsel %vm827_vm3, %v1723_v59, -inf  ;;  %p2891_p13 = scmp.lt.s32.totalorder %s2136_s26, %s2136_s26 }
 0xad7   : > { %1732 = vmax.xlane.f32.xlu0 %v1731_v63 }
 0xadb   : > { %1741 = vadd.xlane.f32.xlu0 %v1740_v53 }
 0xaf1   : > { %1752 = vrot.lane.b32.xlu0 %v3361_v39, %s2990_s17 }
 0xb64   : > { %v1733_v1 = vpop.xlane.xlu0 %1732 }
 0xb65   : > { %v1735_v56 = vsub.f32 %v1723_v59, %v1733_v1  ;;  %v2722_v59 = vld [vmem:[%s3294_s15] sm:$0xff]  }
 0xb67   : > { %v1738_v2 = vmul.f32 1.442695, %v1735_v56  ;;  %v1935_v56 = vsub.s32 3, %v3354_v29 }
 0xb68   : > { %v1742_v4 = vpop.xlane.xlu0 %1741 }
 0xb69   : > { %2752 = vpow2.f32 %v1738_v2  ;;  %v1936_v2 = vrot.slane %v3358_v31, %v1935_v56 }
 0xb6a   : > { %2754 = vrcp.f32 %v1742_v4  ;;  %v1941_v4 = vsub.s32 4, %v3354_v29 }
 0xb6c   : > { %v1753_v48 = vpop.permute.xlu0 %1752 }
 0xb6d   : > { %v1758_v7 = vsel %vm950_vm4, %v1753_v48, 0 }
 0xb6e   : > { %2581 = vmatpush3.bf16.msra.mxu1 %v1758_v7 }
 0xb6f   : > { %2592 = vmatprep.subr.bf16.mxu1 %v2982_v3 }
 0xb73   : > { %v2753_v8 = vpop.eup %2752 }
 0xb74   : > { %v2755_v9 = vpop.eup %2754  ;;  %v1743_v10 = vsel %vm827_vm3, %v2753_v8, 0.0 }
 0xb75   : > { %v1748_v11 = vmul.f32 %v2755_v9, %v2751_v0  ;;  %1744 = vadd.xlane.f32.xlu1 %v1743_v10 }
 0xb77   : > { %v1750_v39 = vpack.c.bf16 %v1748_v11, %v1748_v11  ;;  %v1942_v11 = vrot.slane %v3358_v31, %v1941_v4 }
 0xb79   : > { %2583 = vmatmul.mubr.msk.bf16.vlgmr.msra.gmra.mrb[36].mxu1 %vm827_vm3, %v1750_v39 }
 0xb7a   : > { %2594 = vmatprep.mubr.msk.bf16.mxu1 %vm2983_vm1, %v2982_v3  ;;  %2593 = vmatpush3.bf16.msra.mxu1 %v1853_v13 }
 0xb7b   : > { %2606 = vmatprep.subr.bf16.mxu1 %v2982_v3 }
 0xb86   : > { %1800 = vrot.lane.b32.xlu1 %v3363_v40, %s2990_s17 }
 0xc02   : > { %v1745_v14 = vpop.xlane.xlu1 %1744 }
 0xc03   : > { %2756 = vrcp.f32 %v1745_v14 }
 0xc06   : > { %v1801_v15 = vpop.permute.xlu1 %1800 }
 0xc07   : > { %v1806_v16 = vsel %vm950_vm4, %v1801_v15, 0  ;;  %v2724_v15 = vld [vmem:[%s3294_s15 + $0x10] sm:$0xff]  }
 0xc08   : > { %2587 = vmatpush3.bf16.msra.mxu0 %v1806_v16  ;;  %v2725_v16 = vld [vmem:[%s3294_s15 + $0x18] sm:$0xff]   ;;  %s2884_s15 = scalar_lea.vmem %s2136_s26, 256 }
 0xc09   : > { %2598 = vmatprep.subr.bf16.mxu0 %v2982_v3  ;;  %p2885_p7 = scmp.ne.s32.totalorder %s2136_s26, %s2884_s15  ;;  %p2892_p3 = scmp.lt.s32.totalorder %s2884_s15, %s2884_s15 }
 0xc0b   : > { %p2886_p2 = pnand %p2885_p7, %p2649_p4  ;;  %p2893_p10 = por %p2892_p3, %p2891_p13 }
 0xc0d   : > { %v2757_v17 = vpop.eup %2756  ;;  %p2887_p8 = pneg %p2886_p2 }
 0xc0e   : > { %v1749_v18 = vmul.f32 %v2757_v17, %v2753_v8  ;;  %v2390_v17 = vld [vmem:[%s3682_s23] ss:$0 sm:$0xff] }
 0xc0f   : > { %p2894_p12 = pnand %p2893_p10, %p2887_p8 }
 0xc10   : > { %v1751_v19 = vpack.c.bf16 %v1749_v18, %v1749_v18 }
 0xc12   : > { %2589 = vmatmul.mubr.msk.bf16.vlgmr.msra.gmra.mrb[40].mxu0 %vm827_vm3, %v1751_v19 }
 0xc13   : > { %2602 = vmatprep.mubr.msk.bf16.mxu0 %vm2983_vm1, %v2982_v3  ;;  %2599 = vmatpush3.bf16.msra.mxu0 %v2720_v58 }
 0xc14   : > { %2600 = vmatprep.subr.bf16.mxu0 %v2982_v3 }
 0xc17   : > { %2601 = vmatpush3.bf16.msra.mxu0 %v2721_v20  ;;  %v2114_v20 = vsub.s32 5, %v3354_v29 }
 0xc4c   : > { %v1794_v40 = vpop.f32.mrb[36].mxu1 }
 0xc4d   : > { %v2584_v22 = vpop.f32.mrb[37].mxu1 }
 0xc4e   : > { %v1797_v21 = vpop.f32.mrb[38].mxu1 }
 0xc4f   : > { %v2585_v24 = vpop.f32.mrb[39].mxu1 }
 0xce5   : > { %v1842_v25 = vpop.f32.mrb[40].mxu0 }
 0xce6   : > { %v1848_v23 = vpack.c.bf16 %v1842_v25, %v1794_v40  ;;  %v2590_v26 = vpop.f32.mrb[41].mxu0 }
 0xce7   : > { %v1845_v27 = vpop.f32.mrb[42].mxu0 }
 0xce8   : > { %v2591_v28 = vpop.f32.mrb[43].mxu0  ;;  %2595 = vmatmul.mubr.msk.bf16.vlgmr.msra.gmra.mrb[40].mxu1 %vm827_vm3, %v1848_v23  ;;  %v2013_v27 = vsub.s32 2, %v3354_v29 }
 0xce9   : > { %2614 = vmatprep.mubr.msk.bf16.mxu1 %vm2983_vm1, %v2982_v3  ;;  %2607 = vmatpush3.bf16.msra.mxu1 %v2722_v59  ;;  %v2120_v59 = vsub.s32 6, %v3354_v29 }
 0xcea   : > { %2608 = vmatprep.subr.bf16.mxu1 %v2982_v3  ;;  %v2014_v28 = vrot.slane %v3358_v31, %v2013_v27 }
 0xced   : > { %2609 = vmatpush3.bf16.msra.mxu1 %v2723_v60  ;;  %v2115_v60 = vrot.slane %v3358_v31, %v2114_v20 }
 0xcee   : > { %2610 = vmatprep.subr.bf16.mxu1 %v2982_v3 }
 0xcf1   : > { %2611 = vmatpush3.bf16.msra.mxu1 %v2724_v15 }
 0xcf2   : > { %2612 = vmatprep.subr.bf16.mxu1 %v2982_v3 }
 0xcf5   : > { %2613 = vmatpush3.bf16.msra.mxu1 %v2725_v16 }
 0xdbb   : > { %v1889_v33 = vpop.f32.mrb[40].mxu1 }
 0xdbc   : > { %v1896_v34 = vadd.f32 %v1889_v33, %v3517_v52  ;;  %v2596_v35 = vpop.f32.mrb[41].mxu1 }
 0xdbd   : > { %v1892_v36 = vpop.f32.mrb[42].mxu1 }
 0xdbe   : > { %v1902_v37 = vadd.f32 %v1901_v32, %v1896_v34  ;;  %v1897_v38 = vadd.f32 %v1892_v36, %v3520_v57  ;;  %v2597_v41 = vpop.f32.mrb[43].mxu1 }
 0xdc0   : > { %v1903_v42 = vadd.f32 %v1901_v32, %v1897_v38  ;;  %v1904_v44 = vadd.f32 %v1902_v37, %v3312_v5 }
 0xdc2   : > { %v1906_v45 = vsel %vm702_vm2, %v1904_v44, 0.0  ;;  %v1905_v46 = vadd.f32 %v1903_v42, %v3314_v6 }
 0xdc3   : > { %1907 = vadd.xlane.f32.xlu1 %v1906_v45 }
 0xdc4   : > { %v1909_v43 = vsel %vm702_vm2, %v1905_v46, 0.0 }
 0xdc5   : > { %1910 = vadd.xlane.f32.xlu0 %v1909_v43 }
 0xe50   : > { %v1908_v47 = vpop.xlane.xlu1 %1907 }
 0xe51   : > { %v1913_v49 = vmul.f32 0.03125, %v1908_v47 }
 0xe52   : > { %v1911_v50 = vpop.xlane.xlu0 %1910 }
 0xe53   : > { %v1915_v51 = vsub.f32 %v1904_v44, %v1913_v49  ;;  %v1914_v52 = vmul.f32 0.03125, %v1911_v50 }
 0xe55   : > { %v1916_v54 = vsub.f32 %v1905_v46, %v1914_v52  ;;  %v1917_v55 = vmul.f32 %v1915_v51, %v1915_v51 }
 0xe57   : > { %v1919_v5 = vsel %vm702_vm2, %v1917_v55, 0.0  ;;  %v1918_v57 = vmul.f32 %v1916_v54, %v1916_v54 }
 0xe58   : > { %1920 = vadd.xlane.f32.xlu0 %v1919_v5 }
 0xe59   : > { %v1922_v6 = vsel %vm702_vm2, %v1918_v57, 0.0 }
 0xe5a   : > { %1923 = vadd.xlane.f32.xlu1 %v1922_v6 }
 0xee5   : > { %v1921_v61 = vpop.xlane.xlu0 %1920 }
 0xee6   : > { %v1925_v62 = vmul.f32 0.03125, %v1921_v61 }
 0xee7   : > { %v1924_v63 = vpop.xlane.xlu1 %1923 }
 0xee8   : > { %v1927_v0 = vadd.f32 1e-05, %v1925_v62  ;;  %v1926_v53 = vmul.f32 0.03125, %v1924_v63  ;;  %v2121_v63 = vrot.slane %v3358_v31, %v2120_v59 }
 0xeea   : > { %2758 = vrsqrt.f32 %v1927_v0  ;;  %v1928_v1 = vadd.f32 1e-05, %v1926_v53 }
 0xeec   : > { %2760 = vrsqrt.f32 %v1928_v1 }
 0xef4   : > { %v2759_v48 = vpop.eup %2758 }
 0xef5   : > { %v1931_v7 = vmul.f32 %v2759_v48, %v1915_v51 }
 0xef6   : > { %v2761_v8 = vpop.eup %2760 }
 0xef7   : > { %v1937_v9 = vmul.f32 %v1936_v2, %v1931_v7  ;;  %v1932_v10 = vmul.f32 %v2761_v8, %v1916_v54 }
 0xef9   : > { %v1938_v39 = vmul.f32 %v1936_v2, %v1932_v10  ;;  %v1943_v12 = vadd.f32 %v1942_v11, %v1937_v9 }
 0xefb   : > { %v1944_v13 = vadd.f32 %v1942_v11, %v1938_v39 }
 0xefd   : > { %v1945_v14 = vpack.c.bf16 %v1944_v13, %v1943_v12 }
 0xeff   : > { %2603 = vmatmul.mubr.msk.bf16.vlgmr.msra.gmra.mrb[44].mxu0 %vm702_vm2, %v1945_v14 }
 0xfd2   : > { %v2001_v18 = vpop.f32.mrb[44].mxu0 }
 0xfd3   : > { %v2002_v19 = vadd.f32 %v2390_v17, %v2001_v18  ;;  %v2604_v40 = vpop.f32.mrb[45].mxu0 }
 0xfd4   : > { %v2004_v22 = vpop.f32.mrb[46].mxu0 }
 0xfd5   : > { %v2005_v21 = vadd.f32 %v2390_v17, %v2004_v22  ;;  %v2605_v24 = vpop.f32.mrb[47].mxu0  ;;  %v2008_v25 = vmax.f32 %v2002_v19, 0.0 }
 0xfd7   : > { %v2009_v23 = vmax.f32 %v2005_v21, 0.0 }
 0xfd9   : > { %v2010_v26 = vpack.c.bf16 %v2009_v23, %v2008_v25 }
 0xfdb   : > { %2615 = vmatmul.mubr.msk.bf16.vlgmr.msra.gmra.mrb[44].mxu1 %vm2039_vm5, %v2010_v26 }
0x10ae   : > { %v2077_v3 = vpop.f32.mrb[44].mxu1 }
0x10af   : > { %v2078_v30 = vadd.f32 %v2077_v3, %v2014_v28  ;;  %v2616_v32 = vpop.f32.mrb[45].mxu1 }
0x10b0   : > { %v2080_v33 = vpop.f32.mrb[46].mxu1 }
0x10b1   : > { %v2081_v34 = vadd.f32 %v2080_v33, %v2014_v28  ;;  %v2617_v35 = vpop.f32.mrb[47].mxu1  ;;  %v2084_v36 = vadd.f32 %v2078_v30, %v1943_v12 }
0x10b3   : > { %v2086_v37 = vsel %vm702_vm2, %v2084_v36, 0.0  ;;  %v2085_v38 = vadd.f32 %v2081_v34, %v1944_v13 }
0x10b4   : > { %2087 = vadd.xlane.f32.xlu0 %v2086_v37 }
0x10b5   : > { %v2089_v41 = vsel %vm702_vm2, %v2085_v38, 0.0 }
0x10b6   : > { %2090 = vadd.xlane.f32.xlu1 %v2089_v41 }
0x1141   : > { %v2088_v42 = vpop.xlane.xlu0 %2087 }
0x1142   : > { %v2092_v44 = vmul.f32 0.03125, %v2088_v42 }
0x1143   : > { %v2091_v45 = vpop.xlane.xlu1 %2090 }
0x1144   : > { %v2094_v46 = vsub.f32 %v2084_v36, %v2092_v44  ;;  %v2093_v43 = vmul.f32 0.03125, %v2091_v45 }
0x1146   : > { %v2095_v47 = vsub.f32 %v2085_v38, %v2093_v43  ;;  %v2096_v49 = vmul.f32 %v2094_v46, %v2094_v46 }
0x1148   : > { %v2098_v50 = vsel %vm702_vm2, %v2096_v49, 0.0  ;;  %v2097_v51 = vmul.f32 %v2095_v47, %v2095_v47 }
0x1149   : > { %2099 = vadd.xlane.f32.xlu0 %v2098_v50 }
0x114a   : > { %v2101_v52 = vsel %vm702_vm2, %v2097_v51, 0.0 }
0x114b   : > { %2102 = vadd.xlane.f32.xlu1 %v2101_v52 }
0x11d6   : > { %v2100_v54 = vpop.xlane.xlu0 %2099 }
0x11d7   : > { %v2104_v55 = vmul.f32 0.03125, %v2100_v54 }
0x11d8   : > { %v2103_v5 = vpop.xlane.xlu1 %2102 }
0x11d9   : > { %v2106_v57 = vadd.f32 1e-05, %v2104_v55  ;;  %v2105_v6 = vmul.f32 0.03125, %v2103_v5 }
0x11db   : > { %2762 = vrsqrt.f32 %v2106_v57  ;;  %v2107_v58 = vadd.f32 1e-05, %v2105_v6 }
0x11dd   : > { %2764 = vrsqrt.f32 %v2107_v58 }
0x11e5   : > { %v2763_v61 = vpop.eup %2762 }
0x11e6   : > { %v2110_v62 = vmul.f32 %v2763_v61, %v2094_v46 }
0x11e7   : > { %v2765_v0 = vpop.eup %2764 }
0x11e8   : > { %v2116_v53 = vmul.f32 %v2115_v60, %v2110_v62  ;;  %v2111_v1 = vmul.f32 %v2765_v0, %v2095_v47 }
0x11ea   : > { %v2117_v56 = vmul.f32 %v2115_v60, %v2111_v1  ;;  %v2122_v2 = vadd.f32 %v2121_v63, %v2116_v53 }
0x11ec   : > { %v2123_v4 = vadd.f32 %v2121_v63, %v2117_v56  ;;  %2124 = vst.msk [vmem:[#allocation10] sm:$0xff] %vm702_vm2, %v2122_v2 }
0x11ee   : > { %2125 = vst.msk [vmem:[#allocation10 + $0x8] sm:$0xff] %vm702_vm2, %v2123_v4 }
0x11ef   : > { %2897 = shalt.err (!%p2894_p12)
}
0x11f0   : > { %s3683_s13 = sld [smem:[#allocation24_spill]] }
0x11f6   : > { %s2898_s20 = scalar_lea.hbm %s3683_s13, 256 }
0x11f7   : > { %p2899_p11 = scmp.ne.s32.totalorder %s3683_s13, %s2898_s20  ;;  %p2904_p6 = scmp.lt.u32.totalorder %s2898_s20, %s3683_s13 }
0x11f9   : > { %p2900_p5 = pnand %p2899_p11, %p2649_p4 }
0x11fb   : > { %p2901_p9 = pneg %p2900_p5 }
0x11fd   : > { %p2906_p0 = pnand %p2904_p6, %p2901_p9 }
0x11ff   : > { %2909 = shalt.err (!%p2906_p0)
}
0x1200   : > { %s2992_s0 = smov 128   ;;  %s2993_s2 = smov 8  }
0x1201   : > { %2629 = dma.vmem_to_hbm [thread:$0]  (%p2649_p4), %s2136_s26, 256, %s3683_s13, [#allocation4], %s2992_s0, %s2992_s0, %s2993_s2  }
0x1202   : > { %2947 = dma.done.wait (%p2649_p4), [#allocation4], 256  }
0x1203   : > { %2949 = vsyncadd (%p2649_p4), [#allocation4], 4294967040 }
0x1204 PF: > { %s3684_s22 = sld [smem:[#allocation16_spill]]  ;;  %s3685_s24 = sld [smem:[#allocation15_spill]] }
0x1205   : > { %s3686_s19 = sld [smem:[#allocation18_spill]]  ;;  %s3687_s30 = sld [smem:[#allocation17_spill]] }
0x1206   : > { %s3688_s17 = smov %s2956_s18  ;;  %s3690_s20 = smov %s2968_s21 }
0x120a   : > { %s29_s22 = sadd.s32 1, %s3684_s22   ;;  %s3689_s18 = smov %s3685_s24 }
0x120b   : > { %p26_p1 = scmp.ge.s32.totalorder %s29_s22, 4   ;;  %s3691_s21 = smov %s3687_s30 }
0x120d   :  { %28 = sbr.rel (!%p26_p1) target bundleno = 15 (0xf), region = 157 }
0x1214   :  { %2151 = vsyncpa [#allocation3], 1 }
0x1215   :  { %2153 = vsyncpa [#allocation3 + $0x1], 1 }
0x1216   :  { %2154 = vsyncpa [#allocation6], 1 }
0x1217   :  { %2156 = vsyncpa [#allocation6 + $0x1], 1 }
0x1218   :  { %2157 = vsyncpa [#allocation9], 1 }
0x1219   :  { %2159 = vsyncpa [#allocation9 + $0x1], 1 }
0x121a   :  { %2160 = vsyncpa [#allocation4], 1 }
0x121b   :  { %2162 = vsyncpa [#allocation4 + $0x1], 1 }

</bundles_post_ra>
